<compile_context>
chip_gen: v6e
topology: v6e:2x2x1
jax: 0.10.0
libtpu: 0.0.40
codegen_flags: <defaults>
</compile_context>

<pallas_src>
import math
import numpy as np

import jax
import jax.numpy as jnp
from jax import lax
from jax.experimental import pallas as pl
from jax.experimental.pallas import tpu as pltpu

# ---- Resample configuration (matches torchaudio defaults) -------------------
SAMPLE_RATE = 48000           # module __init__ arg; != 16000 -> resampler active
NEW_RATE = 16000
_GCD = math.gcd(SAMPLE_RATE, NEW_RATE)
ORIG = SAMPLE_RATE // _GCD    # 3
NEW = NEW_RATE // _GCD        # 1
LOWPASS_FILTER_WIDTH = 6
ROLLOFF = 0.99


def _cdiv(a, b):
    return -(-a // b)


def _round_up(a, b):
    return _cdiv(a, b) * b


def _sinc_resample_kernel():
    """Reproduces torchaudio._get_sinc_resample_kernel (sinc_interp_hann)."""
    base_freq = min(ORIG, NEW) * ROLLOFF
    width = int(math.ceil(LOWPASS_FILTER_WIDTH * ORIG / base_freq))
    idx = np.arange(-width, width + ORIG, dtype=np.float64) / ORIG
    t = (-np.arange(NEW, dtype=np.float64) / NEW)[:, None] + idx[None, :]
    t = t * base_freq
    t = np.clip(t, -LOWPASS_FILTER_WIDTH, LOWPASS_FILTER_WIDTH)
    window = np.cos(t * np.pi / LOWPASS_FILTER_WIDTH / 2.0) ** 2
    t = t * np.pi
    safe_t = np.where(t == 0.0, 1.0, t)
    kern = np.where(t == 0.0, 1.0, np.sin(safe_t) / safe_t)
    kern = kern * window * (base_freq / ORIG)        # shape (NEW, 2*width + ORIG)
    return kern.astype(np.float32), width


_KERNEL_NP, _WIDTH = _sinc_resample_kernel()          # (1, 41), width = 19
_K = _KERNEL_NP.shape[1]                              # 41 taps
_Q = (_K + ORIG - 1) // ORIG                          # 14 polyphase offsets

# Taps baked as compile-time Python constants, zero padded to _Q * ORIG.
_W_PAD = np.zeros(_Q * ORIG, dtype=np.float64)
_W_PAD[:_K] = _KERNEL_NP.reshape(-1).astype(np.float64)

_HALO = 128                   # lane-aligned halo block (>= _Q - 1 = 13)
assert _HALO >= _Q - 1 and _HALO % 128 == 0


# ---- Pallas kernel: polyphase strided sinc convolution ----------------------
def _make_resample_kernel(chunk):
    """Builds the resampling kernel for a given output lane chunk (mult of 128)."""
    win_lanes = chunk + _HALO     # window needed for `chunk` outputs (q <= 13)

    def _chunk_out(win):
        # win: (ORIG, nb, chunk + _HALO) register-resident f32 value.
        #   out[n, j] = sum_{q, r} win[r, n, j + q] * W[ORIG*q + r]
        acc = None
        for q in range(_Q):
            # Combine the 3 phase taps of offset q first (VPU) so only ONE
            # lane shift per q is needed (XLU), not one per phase row.
            cq = None
            for r in range(ORIG):
                w = float(_W_PAD[q * ORIG + r])
                if w != 0.0:
                    term = win[r] * w
                    cq = term if cq is None else cq + term
            if cq is None:
                continue
            if q:
                # sq[:, j] = cq[:, j + q]; positive-shift equivalent of
                # jnp.roll(cq, -q, axis=-1), executed on the (otherwise idle) XLU.
                cq = pltpu.roll(cq, shift=win_lanes - q, axis=1)
            sq = cq[:, :chunk]                       # lane-aligned slice
            acc = sq if acc is None else acc + sq
        return acc

    def kernel(cur_ref, halo_ref, out_ref):
        # cur_ref : (ORIG, nb, t_tile)   current polyphase time tile
        # halo_ref: (ORIG, nb, _HALO)    head of the NEXT time tile
        # out_ref : (nb, t_tile)         resampled output tile
        t_tile = out_ref.shape[1]
        n_chunks = t_tile // chunk
        # Interior chunks: window lives entirely inside the current tile;
        # one lane-aligned vld per chunk, no scratch, no re-reads per tap.
        for c in range(n_chunks - 1):
            o = c * chunk
            win = cur_ref[:, :, o:o + win_lanes]
            out_ref[:, o:o + chunk] = _chunk_out(win)
        # Boundary chunk: stitch the tile tail with the 128-lane halo in
        # registers (value concat; no VMEM scratch round-trip).
        o = (n_chunks - 1) * chunk
        win = jnp.concatenate([cur_ref[:, :, o:o + chunk], halo_ref[...]], axis=-1)
        out_ref[:, o:o + chunk] = _chunk_out(win)

    return kernel


def resample_pallas(x):
    """torchaudio Resample(SAMPLE_RATE -> 16000) forward for (rows, time) audio."""
    x = x.astype(jnp.float32)
    n, t = x.shape
    t_out = _cdiv(t * NEW, ORIG)                 # torchaudio target_length

    # -- adaptive row blocking (rows = 2*B after the wrapper-side concat) -----
    n_pad = _round_up(n, 8)
    nb = max(d for d in (8, 16, 24, 32) if n_pad % d == 0)
    # Lane chunk per nb keeps a chunk's working set (window + partials + acc)
    # comfortably inside the 64-vreg file; per-step work ~ nb * t_tile.
    chunk = {8: 512, 16: 256, 24: 128, 32: 128}[nb]
    t_tile_max = 4 * chunk                       # <= 4 chunks (~16K samples) per step

    # -- time tiling: big tiles to amortize per-step overhead and the halo
    #    re-fetch, but keep >= 2 time blocks when the clip is long enough so
    #    both v7x TensorCores get work (the row axis is 1 block at small B). ---
    t_tile = min(t_tile_max, max(chunk, _round_up(_cdiv(t_out, 2), chunk)))
    nt = _cdiv(t_out, t_tile)
    t_out_pad = nt * t_tile                      # lane-dense output (multiple of 128)
    m_pad = t_out_pad + _HALO                    # invariant: last block's halo in bounds

    # Single pad: rows -> n_pad, time -> sinc left pad + zero right pad.
    right = ORIG * m_pad - _WIDTH - t
    xp = jnp.pad(x, ((0, n_pad - n), (_WIDTH, right)))
    # Polyphase split (wrapper-side reshape+transpose): phases[r, b, m] = xp[b, ORIG*m + r]
    # TODO(synk): if profiling shows this XLA pad+transpose pass rivaling the
    # kernel on long clips (v5e/v6e HBM-bound), fold the de-interleave in-kernel.
    phases = xp.reshape(n_pad, m_pad, ORIG).transpose(2, 0, 1)

    halo_blocks_per_tile = t_tile // _HALO
    out = pl.pallas_call(
        _make_resample_kernel(chunk),
        out_shape=jax.ShapeDtypeStruct((n_pad, t_out_pad), jnp.float32),
        grid=(n_pad // nb, nt),
        in_specs=[
            # current tile of the polyphase signal
            pl.BlockSpec((ORIG, nb, t_tile), lambda b, j: (0, b, j)),
            # halo: first 128 polyphase samples of the NEXT time tile
            pl.BlockSpec((ORIG, nb, _HALO),
                         lambda b, j: (0, b, (j + 1) * halo_blocks_per_tile)),
        ],
        out_specs=pl.BlockSpec((nb, t_tile), lambda b, j: (b, j)),
        compiler_params=pltpu.CompilerParams(
            dimension_semantics=("parallel", "parallel")),
    )(phases, phases)
    return out[:n, :t_out]


def resample_reference(x):
    """Pure-JAX reference (lax strided conv), mirrors torchaudio exactly."""
    x = x.astype(jnp.float32)
    b, t = x.shape
    t_out = _cdiv(t * NEW, ORIG)
    xp = jnp.pad(x, ((0, 0), (_WIDTH, _WIDTH + ORIG)))[:, None, :]     # (B,1,Tp)
    w = jnp.asarray(_KERNEL_NP)[:, None, :]                            # (O,I,K)
    y = lax.conv_general_dilated(xp, w, (ORIG,), "VALID",
                                 dimension_numbers=("NCH", "OIH", "NCH"),
                                 precision=lax.Precision.HIGHEST)
    return jnp.transpose(y, (0, 2, 1)).reshape(b, -1)[:, :t_out]


@jax.jit
def pesq_metric_forward(inputs, targets):
    """PESQMetric.forward: resample both signals to 16 kHz on TPU (one fused call)."""
    b = inputs.shape[0]
    both = jnp.concatenate([inputs, targets], axis=0)   # (2B, T): one kernel launch
    both_16k = resample_pallas(both)
    inputs_16k, targets_16k = both_16k[:b], both_16k[b:]
    # TODO(synk): the ITU-T P.862 PESQ perceptual model (external CPU `pesq` C
    # library, float64, per-item python loop + 1/B averaging) has no Pallas
    # equivalent; only the on-device resampler hot path runs on TPU.
    return inputs_16k, targets_16k


if __name__ == "__main__":
    key = jax.random.PRNGKey(0)
    k1, k2 = jax.random.split(key)
    B, T = 2, 4800                      # 0.1 s of 48 kHz audio
    inputs = jax.random.normal(k1, (B, T), dtype=jnp.float32)
    targets = jax.random.normal(k2, (B, T), dtype=jnp.float32)

    inputs_16k, targets_16k = pesq_metric_forward(inputs, targets)
    jax.block_until_ready((inputs_16k, targets_16k))

    # Validate the Pallas resampler against the pure-JAX reference conv.
    t_out = _cdiv(T * NEW, ORIG)
    ref_in = resample_reference(inputs)
    ref_tg = resample_reference(targets)
    assert inputs_16k.shape == (B, t_out) and targets_16k.shape == (B, t_out)
    assert jnp.allclose(inputs_16k, ref_in, rtol=1e-4, atol=1e-5), \
        float(jnp.max(jnp.abs(inputs_16k - ref_in)))
    assert jnp.allclose(targets_16k, ref_tg, rtol=1e-4, atol=1e-5), \
        float(jnp.max(jnp.abs(targets_16k - ref_tg)))

    # Longer clip: exercises the large (2048-lane) tiles and multi-chunk path.
    T2 = 48000
    x2 = jax.random.normal(k1, (B, T2), dtype=jnp.float32)
    y2 = jax.jit(resample_pallas)(x2)
    jax.block_until_ready(y2)
    ref2 = resample_reference(x2)
    assert jnp.allclose(y2, ref2, rtol=1e-4, atol=1e-5), \
        float(jnp.max(jnp.abs(y2 - ref2)))

    print("KERNEL_OK")
</pallas_src>

<mosaic_0001>
module attributes {stable_mosaic.version = 11 : i64} {
  func.func @kernel(%arg0: i32, %arg1: i32, %arg2: memref<3x8x1024xf32, #tpu.memory_space<vmem>>, %arg3: memref<3x8x128xf32, #tpu.memory_space<vmem>>, %arg4: memref<8x1024xf32, #tpu.memory_space<vmem>>) attributes {dimension_semantics = [#tpu.dimension_semantics<parallel>, #tpu.dimension_semantics<parallel>], iteration_bounds = array<i64: 1, 2>, scalar_prefetch = 0 : i64, scratch_operands = 0 : i64, tpu.core_type = #tpu.core_type<tc>, window_params = [{transform_indices = @transform_0, window_bounds = array<i64: 3, 8, 1024>}, {transform_indices = @transform_1, window_bounds = array<i64: 3, 8, 128>}, {transform_indices = @transform_2, window_bounds = array<i64: 8, 1024>}]} {
    %c0 = arith.constant 0 : index
    %c0_0 = arith.constant 0 : index
    %c0_1 = arith.constant 0 : index
    %0 = vector.load %arg2[%c0, %c0_0, %c0_1] : memref<3x8x1024xf32, #tpu.memory_space<vmem>>, vector<3x8x640xf32>
    %1 = vector.extract_strided_slice %0 {offsets = [1, 0, 0], sizes = [1, 8, 640], strides = [1, 1, 1]} : vector<3x8x640xf32> to vector<1x8x640xf32>
    %2 = vector.shape_cast %1 : vector<1x8x640xf32> to vector<8x640xf32>
    %cst = arith.constant -8.17537966E-7 : f32
    %3 = vector.broadcast %cst : f32 to vector<8x640xf32>
    %4 = arith.mulf %2, %3 : vector<8x640xf32>
    %5 = vector.extract_strided_slice %0 {offsets = [2, 0, 0], sizes = [1, 8, 640], strides = [1, 1, 1]} : vector<3x8x640xf32> to vector<1x8x640xf32>
    %6 = vector.shape_cast %5 : vector<1x8x640xf32> to vector<8x640xf32>
    %cst_2 = arith.constant -1.83017488E-4 : f32
    %7 = vector.broadcast %cst_2 : f32 to vector<8x640xf32>
    %8 = arith.mulf %6, %7 : vector<8x640xf32>
    %9 = arith.addf %4, %8 : vector<8x640xf32>
    %10 = vector.extract_strided_slice %9 {offsets = [0, 0], sizes = [8, 512], strides = [1, 1]} : vector<8x640xf32> to vector<8x512xf32>
    %11 = vector.extract_strided_slice %0 {offsets = [0, 0, 0], sizes = [1, 8, 640], strides = [1, 1, 1]} : vector<3x8x640xf32> to vector<1x8x640xf32>
    %12 = vector.shape_cast %11 : vector<1x8x640xf32> to vector<8x640xf32>
    %cst_3 = arith.constant -5.38223714E-4 : f32
    %13 = vector.broadcast %cst_3 : f32 to vector<8x640xf32>
    %14 = arith.mulf %12, %13 : vector<8x640xf32>
    %15 = vector.extract_strided_slice %0 {offsets = [1, 0, 0], sizes = [1, 8, 640], strides = [1, 1, 1]} : vector<3x8x640xf32> to vector<1x8x640xf32>
    %16 = vector.shape_cast %15 : vector<1x8x640xf32> to vector<8x640xf32>
    %cst_4 = arith.constant 2.44590978E-4 : f32
    %17 = vector.broadcast %cst_4 : f32 to vector<8x640xf32>
    %18 = arith.mulf %16, %17 : vector<8x640xf32>
    %19 = arith.addf %14, %18 : vector<8x640xf32>
    %20 = vector.extract_strided_slice %0 {offsets = [2, 0, 0], sizes = [1, 8, 640], strides = [1, 1, 1]} : vector<3x8x640xf32> to vector<1x8x640xf32>
    %21 = vector.shape_cast %20 : vector<1x8x640xf32> to vector<8x640xf32>
    %cst_5 = arith.constant 0.00264129974 : f32
    %22 = vector.broadcast %cst_5 : f32 to vector<8x640xf32>
    %23 = arith.mulf %21, %22 : vector<8x640xf32>
    %24 = arith.addf %19, %23 : vector<8x640xf32>
    %c639_i32 = arith.constant 639 : i32
    %25 = tpu.dynamic_rotate %24 by %c639_i32 dim 1 : vector<8x640xf32>, i32 -> vector<8x640xf32>
    %26 = vector.extract_strided_slice %25 {offsets = [0, 0], sizes = [8, 512], strides = [1, 1]} : vector<8x640xf32> to vector<8x512xf32>
    %27 = arith.addf %10, %26 : vector<8x512xf32>
    %28 = vector.extract_strided_slice %0 {offsets = [0, 0, 0], sizes = [1, 8, 640], strides = [1, 1, 1]} : vector<3x8x640xf32> to vector<1x8x640xf32>
    %29 = vector.shape_cast %28 : vector<1x8x640xf32> to vector<8x640xf32>
    %cst_6 = arith.constant 0.00362526067 : f32
    %30 = vector.broadcast %cst_6 : f32 to vector<8x640xf32>
    %31 = arith.mulf %29, %30 : vector<8x640xf32>
    %32 = vector.extract_strided_slice %0 {offsets = [1, 0, 0], sizes = [1, 8, 640], strides = [1, 1, 1]} : vector<3x8x640xf32> to vector<1x8x640xf32>
    %33 = vector.shape_cast %32 : vector<1x8x640xf32> to vector<8x640xf32>
    %cst_7 = arith.constant -8.61472392E-4 : f32
    %34 = vector.broadcast %cst_7 : f32 to vector<8x640xf32>
    %35 = arith.mulf %33, %34 : vector<8x640xf32>
    %36 = arith.addf %31, %35 : vector<8x640xf32>
    %37 = vector.extract_strided_slice %0 {offsets = [2, 0, 0], sizes = [1, 8, 640], strides = [1, 1, 1]} : vector<3x8x640xf32> to vector<1x8x640xf32>
    %38 = vector.shape_cast %37 : vector<1x8x640xf32> to vector<8x640xf32>
    %cst_8 = arith.constant -0.00897746626 : f32
    %39 = vector.broadcast %cst_8 : f32 to vector<8x640xf32>
    %40 = arith.mulf %38, %39 : vector<8x640xf32>
    %41 = arith.addf %36, %40 : vector<8x640xf32>
    %c638_i32 = arith.constant 638 : i32
    %42 = tpu.dynamic_rotate %41 by %c638_i32 dim 1 : vector<8x640xf32>, i32 -> vector<8x640xf32>
    %43 = vector.extract_strided_slice %42 {offsets = [0, 0], sizes = [8, 512], strides = [1, 1]} : vector<8x640xf32> to vector<8x512xf32>
    %44 = arith.addf %27, %43 : vector<8x512xf32>
    %45 = vector.extract_strided_slice %0 {offsets = [0, 0, 0], sizes = [1, 8, 640], strides = [1, 1, 1]} : vector<3x8x640xf32> to vector<1x8x640xf32>
    %46 = vector.shape_cast %45 : vector<1x8x640xf32> to vector<8x640xf32>
    %cst_9 = arith.constant -0.0108616697 : f32
    %47 = vector.broadcast %cst_9 : f32 to vector<8x640xf32>
    %48 = arith.mulf %46, %47 : vector<8x640xf32>
    %49 = vector.extract_strided_slice %0 {offsets = [1, 0, 0], sizes = [1, 8, 640], strides = [1, 1, 1]} : vector<3x8x640xf32> to vector<1x8x640xf32>
    %50 = vector.shape_cast %49 : vector<1x8x640xf32> to vector<8x640xf32>
    %cst_10 = arith.constant 0.00169034046 : f32
    %51 = vector.broadcast %cst_10 : f32 to vector<8x640xf32>
    %52 = arith.mulf %50, %51 : vector<8x640xf32>
    %53 = arith.addf %48, %52 : vector<8x640xf32>
    %54 = vector.extract_strided_slice %0 {offsets = [2, 0, 0], sizes = [1, 8, 640], strides = [1, 1, 1]} : vector<3x8x640xf32> to vector<1x8x640xf32>
    %55 = vector.shape_cast %54 : vector<1x8x640xf32> to vector<8x640xf32>
    %cst_11 = arith.constant 0.0213740058 : f32
    %56 = vector.broadcast %cst_11 : f32 to vector<8x640xf32>
    %57 = arith.mulf %55, %56 : vector<8x640xf32>
    %58 = arith.addf %53, %57 : vector<8x640xf32>
    %c637_i32 = arith.constant 637 : i32
    %59 = tpu.dynamic_rotate %58 by %c637_i32 dim 1 : vector<8x640xf32>, i32 -> vector<8x640xf32>
    %60 = vector.extract_strided_slice %59 {offsets = [0, 0], sizes = [8, 512], strides = [1, 1]} : vector<8x640xf32> to vector<8x512xf32>
    %61 = arith.addf %44, %60 : vector<8x512xf32>
    %62 = vector.extract_strided_slice %0 {offsets = [0, 0, 0], sizes = [1, 8, 640], strides = [1, 1, 1]} : vector<3x8x640xf32> to vector<1x8x640xf32>
    %63 = vector.shape_cast %62 : vector<1x8x640xf32> to vector<8x640xf32>
    %cst_12 = arith.constant 0.025451893 : f32
    %64 = vector.broadcast %cst_12 : f32 to vector<8x640xf32>
    %65 = arith.mulf %63, %64 : vector<8x640xf32>
    %66 = vector.extract_strided_slice %0 {offsets = [1, 0, 0], sizes = [1, 8, 640], strides = [1, 1, 1]} : vector<3x8x640xf32> to vector<1x8x640xf32>
    %67 = vector.shape_cast %66 : vector<1x8x640xf32> to vector<8x640xf32>
    %cst_13 = arith.constant -0.00251341448 : f32
    %68 = vector.broadcast %cst_13 : f32 to vector<8x640xf32>
    %69 = arith.mulf %67, %68 : vector<8x640xf32>
    %70 = arith.addf %65, %69 : vector<8x640xf32>
    %71 = vector.extract_strided_slice %0 {offsets = [2, 0, 0], sizes = [1, 8, 640], strides = [1, 1, 1]} : vector<3x8x640xf32> to vector<1x8x640xf32>
    %72 = vector.shape_cast %71 : vector<1x8x640xf32> to vector<8x640xf32>
    %cst_14 = arith.constant -0.0467810147 : f32
    %73 = vector.broadcast %cst_14 : f32 to vector<8x640xf32>
    %74 = arith.mulf %72, %73 : vector<8x640xf32>
    %75 = arith.addf %70, %74 : vector<8x640xf32>
    %c636_i32 = arith.constant 636 : i32
    %76 = tpu.dynamic_rotate %75 by %c636_i32 dim 1 : vector<8x640xf32>, i32 -> vector<8x640xf32>
    %77 = vector.extract_strided_slice %76 {offsets = [0, 0], sizes = [8, 512], strides = [1, 1]} : vector<8x640xf32> to vector<8x512xf32>
    %78 = arith.addf %61, %77 : vector<8x512xf32>
    %79 = vector.extract_strided_slice %0 {offsets = [0, 0, 0], sizes = [1, 8, 640], strides = [1, 1, 1]} : vector<3x8x640xf32> to vector<1x8x640xf32>
    %80 = vector.shape_cast %79 : vector<1x8x640xf32> to vector<8x640xf32>
    %cst_15 = arith.constant -0.0594799332 : f32
    %81 = vector.broadcast %cst_15 : f32 to vector<8x640xf32>
    %82 = arith.mulf %80, %81 : vector<8x640xf32>
    %83 = vector.extract_strided_slice %0 {offsets = [1, 0, 0], sizes = [1, 8, 640], strides = [1, 1, 1]} : vector<3x8x640xf32> to vector<1x8x640xf32>
    %84 = vector.shape_cast %83 : vector<1x8x640xf32> to vector<8x640xf32>
    %cst_16 = arith.constant 0.00311387354 : f32
    %85 = vector.broadcast %cst_16 : f32 to vector<8x640xf32>
    %86 = arith.mulf %84, %85 : vector<8x640xf32>
    %87 = arith.addf %82, %86 : vector<8x640xf32>
    %88 = vector.extract_strided_slice %0 {offsets = [2, 0, 0], sizes = [1, 8, 640], strides = [1, 1, 1]} : vector<3x8x640xf32> to vector<1x8x640xf32>
    %89 = vector.shape_cast %88 : vector<1x8x640xf32> to vector<8x640xf32>
    %cst_17 = arith.constant 0.135345906 : f32
    %90 = vector.broadcast %cst_17 : f32 to vector<8x640xf32>
    %91 = arith.mulf %89, %90 : vector<8x640xf32>
    %92 = arith.addf %87, %91 : vector<8x640xf32>
    %c635_i32 = arith.constant 635 : i32
    %93 = tpu.dynamic_rotate %92 by %c635_i32 dim 1 : vector<8x640xf32>, i32 -> vector<8x640xf32>
    %94 = vector.extract_strided_slice %93 {offsets = [0, 0], sizes = [8, 512], strides = [1, 1]} : vector<8x640xf32> to vector<8x512xf32>
    %95 = arith.addf %78, %94 : vector<8x512xf32>
    %96 = vector.extract_strided_slice %0 {offsets = [0, 0, 0], sizes = [1, 8, 640], strides = [1, 1, 1]} : vector<3x8x640xf32> to vector<1x8x640xf32>
    %97 = vector.shape_cast %96 : vector<1x8x640xf32> to vector<8x640xf32>
    %cst_18 = arith.constant 0.271942794 : f32
    %98 = vector.broadcast %cst_18 : f32 to vector<8x640xf32>
    %99 = arith.mulf %97, %98 : vector<8x640xf32>
    %100 = vector.extract_strided_slice %0 {offsets = [1, 0, 0], sizes = [1, 8, 640], strides = [1, 1, 1]} : vector<3x8x640xf32> to vector<1x8x640xf32>
    %101 = vector.shape_cast %100 : vector<1x8x640xf32> to vector<8x640xf32>
    %cst_19 = arith.constant 3.300000e-01 : f32
    %102 = vector.broadcast %cst_19 : f32 to vector<8x640xf32>
    %103 = arith.mulf %101, %102 : vector<8x640xf32>
    %104 = arith.addf %99, %103 : vector<8x640xf32>
    %105 = vector.extract_strided_slice %0 {offsets = [2, 0, 0], sizes = [1, 8, 640], strides = [1, 1, 1]} : vector<3x8x640xf32> to vector<1x8x640xf32>
    %106 = vector.shape_cast %105 : vector<1x8x640xf32> to vector<8x640xf32>
    %cst_20 = arith.constant 0.271942794 : f32
    %107 = vector.broadcast %cst_20 : f32 to vector<8x640xf32>
    %108 = arith.mulf %106, %107 : vector<8x640xf32>
    %109 = arith.addf %104, %108 : vector<8x640xf32>
    %c634_i32 = arith.constant 634 : i32
    %110 = tpu.dynamic_rotate %109 by %c634_i32 dim 1 : vector<8x640xf32>, i32 -> vector<8x640xf32>
    %111 = vector.extract_strided_slice %110 {offsets = [0, 0], sizes = [8, 512], strides = [1, 1]} : vector<8x640xf32> to vector<8x512xf32>
    %112 = arith.addf %95, %111 : vector<8x512xf32>
    %113 = vector.extract_strided_slice %0 {offsets = [0, 0, 0], sizes = [1, 8, 640], strides = [1, 1, 1]} : vector<3x8x640xf32> to vector<1x8x640xf32>
    %114 = vector.shape_cast %113 : vector<1x8x640xf32> to vector<8x640xf32>
    %cst_21 = arith.constant 0.135345906 : f32
    %115 = vector.broadcast %cst_21 : f32 to vector<8x640xf32>
    %116 = arith.mulf %114, %115 : vector<8x640xf32>
    %117 = vector.extract_strided_slice %0 {offsets = [1, 0, 0], sizes = [1, 8, 640], strides = [1, 1, 1]} : vector<3x8x640xf32> to vector<1x8x640xf32>
    %118 = vector.shape_cast %117 : vector<1x8x640xf32> to vector<8x640xf32>
    %cst_22 = arith.constant 0.00311387354 : f32
    %119 = vector.broadcast %cst_22 : f32 to vector<8x640xf32>
    %120 = arith.mulf %118, %119 : vector<8x640xf32>
    %121 = arith.addf %116, %120 : vector<8x640xf32>
    %122 = vector.extract_strided_slice %0 {offsets = [2, 0, 0], sizes = [1, 8, 640], strides = [1, 1, 1]} : vector<3x8x640xf32> to vector<1x8x640xf32>
    %123 = vector.shape_cast %122 : vector<1x8x640xf32> to vector<8x640xf32>
    %cst_23 = arith.constant -0.0594799332 : f32
    %124 = vector.broadcast %cst_23 : f32 to vector<8x640xf32>
    %125 = arith.mulf %123, %124 : vector<8x640xf32>
    %126 = arith.addf %121, %125 : vector<8x640xf32>
    %c633_i32 = arith.constant 633 : i32
    %127 = tpu.dynamic_rotate %126 by %c633_i32 dim 1 : vector<8x640xf32>, i32 -> vector<8x640xf32>
    %128 = vector.extract_strided_slice %127 {offsets = [0, 0], sizes = [8, 512], strides = [1, 1]} : vector<8x640xf32> to vector<8x512xf32>
    %129 = arith.addf %112, %128 : vector<8x512xf32>
    %130 = vector.extract_strided_slice %0 {offsets = [0, 0, 0], sizes = [1, 8, 640], strides = [1, 1, 1]} : vector<3x8x640xf32> to vector<1x8x640xf32>
    %131 = vector.shape_cast %130 : vector<1x8x640xf32> to vector<8x640xf32>
    %cst_24 = arith.constant -0.0467810147 : f32
    %132 = vector.broadcast %cst_24 : f32 to vector<8x640xf32>
    %133 = arith.mulf %131, %132 : vector<8x640xf32>
    %134 = vector.extract_strided_slice %0 {offsets = [1, 0, 0], sizes = [1, 8, 640], strides = [1, 1, 1]} : vector<3x8x640xf32> to vector<1x8x640xf32>
    %135 = vector.shape_cast %134 : vector<1x8x640xf32> to vector<8x640xf32>
    %cst_25 = arith.constant -0.00251341448 : f32
    %136 = vector.broadcast %cst_25 : f32 to vector<8x640xf32>
    %137 = arith.mulf %135, %136 : vector<8x640xf32>
    %138 = arith.addf %133, %137 : vector<8x640xf32>
    %139 = vector.extract_strided_slice %0 {offsets = [2, 0, 0], sizes = [1, 8, 640], strides = [1, 1, 1]} : vector<3x8x640xf32> to vector<1x8x640xf32>
    %140 = vector.shape_cast %139 : vector<1x8x640xf32> to vector<8x640xf32>
    %cst_26 = arith.constant 0.025451893 : f32
    %141 = vector.broadcast %cst_26 : f32 to vector<8x640xf32>
    %142 = arith.mulf %140, %141 : vector<8x640xf32>
    %143 = arith.addf %138, %142 : vector<8x640xf32>
    %c632_i32 = arith.constant 632 : i32
    %144 = tpu.dynamic_rotate %143 by %c632_i32 dim 1 : vector<8x640xf32>, i32 -> vector<8x640xf32>
    %145 = vector.extract_strided_slice %144 {offsets = [0, 0], sizes = [8, 512], strides = [1, 1]} : vector<8x640xf32> to vector<8x512xf32>
    %146 = arith.addf %129, %145 : vector<8x512xf32>
    %147 = vector.extract_strided_slice %0 {offsets = [0, 0, 0], sizes = [1, 8, 640], strides = [1, 1, 1]} : vector<3x8x640xf32> to vector<1x8x640xf32>
    %148 = vector.shape_cast %147 : vector<1x8x640xf32> to vector<8x640xf32>
    %cst_27 = arith.constant 0.0213740058 : f32
    %149 = vector.broadcast %cst_27 : f32 to vector<8x640xf32>
    %150 = arith.mulf %148, %149 : vector<8x640xf32>
    %151 = vector.extract_strided_slice %0 {offsets = [1, 0, 0], sizes = [1, 8, 640], strides = [1, 1, 1]} : vector<3x8x640xf32> to vector<1x8x640xf32>
    %152 = vector.shape_cast %151 : vector<1x8x640xf32> to vector<8x640xf32>
    %cst_28 = arith.constant 0.00169034046 : f32
    %153 = vector.broadcast %cst_28 : f32 to vector<8x640xf32>
    %154 = arith.mulf %152, %153 : vector<8x640xf32>
    %155 = arith.addf %150, %154 : vector<8x640xf32>
    %156 = vector.extract_strided_slice %0 {offsets = [2, 0, 0], sizes = [1, 8, 640], strides = [1, 1, 1]} : vector<3x8x640xf32> to vector<1x8x640xf32>
    %157 = vector.shape_cast %156 : vector<1x8x640xf32> to vector<8x640xf32>
    %cst_29 = arith.constant -0.0108616697 : f32
    %158 = vector.broadcast %cst_29 : f32 to vector<8x640xf32>
    %159 = arith.mulf %157, %158 : vector<8x640xf32>
    %160 = arith.addf %155, %159 : vector<8x640xf32>
    %c631_i32 = arith.constant 631 : i32
    %161 = tpu.dynamic_rotate %160 by %c631_i32 dim 1 : vector<8x640xf32>, i32 -> vector<8x640xf32>
    %162 = vector.extract_strided_slice %161 {offsets = [0, 0], sizes = [8, 512], strides = [1, 1]} : vector<8x640xf32> to vector<8x512xf32>
    %163 = arith.addf %146, %162 : vector<8x512xf32>
    %164 = vector.extract_strided_slice %0 {offsets = [0, 0, 0], sizes = [1, 8, 640], strides = [1, 1, 1]} : vector<3x8x640xf32> to vector<1x8x640xf32>
    %165 = vector.shape_cast %164 : vector<1x8x640xf32> to vector<8x640xf32>
    %cst_30 = arith.constant -0.00897746626 : f32
    %166 = vector.broadcast %cst_30 : f32 to vector<8x640xf32>
    %167 = arith.mulf %165, %166 : vector<8x640xf32>
    %168 = vector.extract_strided_slice %0 {offsets = [1, 0, 0], sizes = [1, 8, 640], strides = [1, 1, 1]} : vector<3x8x640xf32> to vector<1x8x640xf32>
    %169 = vector.shape_cast %168 : vector<1x8x640xf32> to vector<8x640xf32>
    %cst_31 = arith.constant -8.61472392E-4 : f32
    %170 = vector.broadcast %cst_31 : f32 to vector<8x640xf32>
    %171 = arith.mulf %169, %170 : vector<8x640xf32>
    %172 = arith.addf %167, %171 : vector<8x640xf32>
    %173 = vector.extract_strided_slice %0 {offsets = [2, 0, 0], sizes = [1, 8, 640], strides = [1, 1, 1]} : vector<3x8x640xf32> to vector<1x8x640xf32>
    %174 = vector.shape_cast %173 : vector<1x8x640xf32> to vector<8x640xf32>
    %cst_32 = arith.constant 0.00362526067 : f32
    %175 = vector.broadcast %cst_32 : f32 to vector<8x640xf32>
    %176 = arith.mulf %174, %175 : vector<8x640xf32>
    %177 = arith.addf %172, %176 : vector<8x640xf32>
    %c630_i32 = arith.constant 630 : i32
    %178 = tpu.dynamic_rotate %177 by %c630_i32 dim 1 : vector<8x640xf32>, i32 -> vector<8x640xf32>
    %179 = vector.extract_strided_slice %178 {offsets = [0, 0], sizes = [8, 512], strides = [1, 1]} : vector<8x640xf32> to vector<8x512xf32>
    %180 = arith.addf %163, %179 : vector<8x512xf32>
    %181 = vector.extract_strided_slice %0 {offsets = [0, 0, 0], sizes = [1, 8, 640], strides = [1, 1, 1]} : vector<3x8x640xf32> to vector<1x8x640xf32>
    %182 = vector.shape_cast %181 : vector<1x8x640xf32> to vector<8x640xf32>
    %cst_33 = arith.constant 0.00264129974 : f32
    %183 = vector.broadcast %cst_33 : f32 to vector<8x640xf32>
    %184 = arith.mulf %182, %183 : vector<8x640xf32>
    %185 = vector.extract_strided_slice %0 {offsets = [1, 0, 0], sizes = [1, 8, 640], strides = [1, 1, 1]} : vector<3x8x640xf32> to vector<1x8x640xf32>
    %186 = vector.shape_cast %185 : vector<1x8x640xf32> to vector<8x640xf32>
    %cst_34 = arith.constant 2.44590978E-4 : f32
    %187 = vector.broadcast %cst_34 : f32 to vector<8x640xf32>
    %188 = arith.mulf %186, %187 : vector<8x640xf32>
    %189 = arith.addf %184, %188 : vector<8x640xf32>
    %190 = vector.extract_strided_slice %0 {offsets = [2, 0, 0], sizes = [1, 8, 640], strides = [1, 1, 1]} : vector<3x8x640xf32> to vector<1x8x640xf32>
    %191 = vector.shape_cast %190 : vector<1x8x640xf32> to vector<8x640xf32>
    %cst_35 = arith.constant -5.38223714E-4 : f32
    %192 = vector.broadcast %cst_35 : f32 to vector<8x640xf32>
    %193 = arith.mulf %191, %192 : vector<8x640xf32>
    %194 = arith.addf %189, %193 : vector<8x640xf32>
    %c629_i32 = arith.constant 629 : i32
    %195 = tpu.dynamic_rotate %194 by %c629_i32 dim 1 : vector<8x640xf32>, i32 -> vector<8x640xf32>
    %196 = vector.extract_strided_slice %195 {offsets = [0, 0], sizes = [8, 512], strides = [1, 1]} : vector<8x640xf32> to vector<8x512xf32>
    %197 = arith.addf %180, %196 : vector<8x512xf32>
    %198 = vector.extract_strided_slice %0 {offsets = [0, 0, 0], sizes = [1, 8, 640], strides = [1, 1, 1]} : vector<3x8x640xf32> to vector<1x8x640xf32>
    %199 = vector.shape_cast %198 : vector<1x8x640xf32> to vector<8x640xf32>
    %cst_36 = arith.constant -1.83017488E-4 : f32
    %200 = vector.broadcast %cst_36 : f32 to vector<8x640xf32>
    %201 = arith.mulf %199, %200 : vector<8x640xf32>
    %202 = vector.extract_strided_slice %0 {offsets = [1, 0, 0], sizes = [1, 8, 640], strides = [1, 1, 1]} : vector<3x8x640xf32> to vector<1x8x640xf32>
    %203 = vector.shape_cast %202 : vector<1x8x640xf32> to vector<8x640xf32>
    %cst_37 = arith.constant -8.17537966E-7 : f32
    %204 = vector.broadcast %cst_37 : f32 to vector<8x640xf32>
    %205 = arith.mulf %203, %204 : vector<8x640xf32>
    %206 = arith.addf %201, %205 : vector<8x640xf32>
    %c628_i32 = arith.constant 628 : i32
    %207 = tpu.dynamic_rotate %206 by %c628_i32 dim 1 : vector<8x640xf32>, i32 -> vector<8x640xf32>
    %208 = vector.extract_strided_slice %207 {offsets = [0, 0], sizes = [8, 512], strides = [1, 1]} : vector<8x640xf32> to vector<8x512xf32>
    %209 = arith.addf %197, %208 : vector<8x512xf32>
    %c0_38 = arith.constant 0 : index
    %c0_39 = arith.constant 0 : index
    %210 = vector.load %arg4[%c0_38, %c0_39] : memref<8x1024xf32, #tpu.memory_space<vmem>>, vector<8x512xf32>
    tpu.vector_store %arg4[%c0_38, %c0_39], %209 {strides = array<i32>} : memref<8x1024xf32, #tpu.memory_space<vmem>>, vector<8x512xf32>,
    %c0_40 = arith.constant 0 : index
    %c0_41 = arith.constant 0 : index
    %c512 = arith.constant 512 : index
    %211 = vector.load %arg2[%c0_40, %c0_41, %c512] : memref<3x8x1024xf32, #tpu.memory_space<vmem>>, vector<3x8x512xf32>
    %c0_42 = arith.constant 0 : index
    %c0_43 = arith.constant 0 : index
    %c0_44 = arith.constant 0 : index
    %212 = vector.load %arg3[%c0_42, %c0_43, %c0_44] : memref<3x8x128xf32, #tpu.memory_space<vmem>>, vector<3x8x128xf32>
    %213 = tpu.concatenate %211, %212 in 2 : vector<3x8x512xf32>, vector<3x8x128xf32> -> vector<3x8x640xf32>
    %214 = vector.extract_strided_slice %213 {offsets = [1, 0, 0], sizes = [1, 8, 640], strides = [1, 1, 1]} : vector<3x8x640xf32> to vector<1x8x640xf32>
    %215 = vector.shape_cast %214 : vector<1x8x640xf32> to vector<8x640xf32>
    %cst_45 = arith.constant -8.17537966E-7 : f32
    %216 = vector.broadcast %cst_45 : f32 to vector<8x640xf32>
    %217 = arith.mulf %215, %216 : vector<8x640xf32>
    %218 = vector.extract_strided_slice %213 {offsets = [2, 0, 0], sizes = [1, 8, 640], strides = [1, 1, 1]} : vector<3x8x640xf32> to vector<1x8x640xf32>
    %219 = vector.shape_cast %218 : vector<1x8x640xf32> to vector<8x640xf32>
    %cst_46 = arith.constant -1.83017488E-4 : f32
    %220 = vector.broadcast %cst_46 : f32 to vector<8x640xf32>
    %221 = arith.mulf %219, %220 : vector<8x640xf32>
    %222 = arith.addf %217, %221 : vector<8x640xf32>
    %223 = vector.extract_strided_slice %222 {offsets = [0, 0], sizes = [8, 512], strides = [1, 1]} : vector<8x640xf32> to vector<8x512xf32>
    %224 = vector.extract_strided_slice %213 {offsets = [0, 0, 0], sizes = [1, 8, 640], strides = [1, 1, 1]} : vector<3x8x640xf32> to vector<1x8x640xf32>
    %225 = vector.shape_cast %224 : vector<1x8x640xf32> to vector<8x640xf32>
    %cst_47 = arith.constant -5.38223714E-4 : f32
    %226 = vector.broadcast %cst_47 : f32 to vector<8x640xf32>
    %227 = arith.mulf %225, %226 : vector<8x640xf32>
    %228 = vector.extract_strided_slice %213 {offsets = [1, 0, 0], sizes = [1, 8, 640], strides = [1, 1, 1]} : vector<3x8x640xf32> to vector<1x8x640xf32>
    %229 = vector.shape_cast %228 : vector<1x8x640xf32> to vector<8x640xf32>
    %cst_48 = arith.constant 2.44590978E-4 : f32
    %230 = vector.broadcast %cst_48 : f32 to vector<8x640xf32>
    %231 = arith.mulf %229, %230 : vector<8x640xf32>
    %232 = arith.addf %227, %231 : vector<8x640xf32>
    %233 = vector.extract_strided_slice %213 {offsets = [2, 0, 0], sizes = [1, 8, 640], strides = [1, 1, 1]} : vector<3x8x640xf32> to vector<1x8x640xf32>
    %234 = vector.shape_cast %233 : vector<1x8x640xf32> to vector<8x640xf32>
    %cst_49 = arith.constant 0.00264129974 : f32
    %235 = vector.broadcast %cst_49 : f32 to vector<8x640xf32>
    %236 = arith.mulf %234, %235 : vector<8x640xf32>
    %237 = arith.addf %232, %236 : vector<8x640xf32>
    %c639_i32_50 = arith.constant 639 : i32
    %238 = tpu.dynamic_rotate %237 by %c639_i32_50 dim 1 : vector<8x640xf32>, i32 -> vector<8x640xf32>
    %239 = vector.extract_strided_slice %238 {offsets = [0, 0], sizes = [8, 512], strides = [1, 1]} : vector<8x640xf32> to vector<8x512xf32>
    %240 = arith.addf %223, %239 : vector<8x512xf32>
    %241 = vector.extract_strided_slice %213 {offsets = [0, 0, 0], sizes = [1, 8, 640], strides = [1, 1, 1]} : vector<3x8x640xf32> to vector<1x8x640xf32>
    %242 = vector.shape_cast %241 : vector<1x8x640xf32> to vector<8x640xf32>
    %cst_51 = arith.constant 0.00362526067 : f32
    %243 = vector.broadcast %cst_51 : f32 to vector<8x640xf32>
    %244 = arith.mulf %242, %243 : vector<8x640xf32>
    %245 = vector.extract_strided_slice %213 {offsets = [1, 0, 0], sizes = [1, 8, 640], strides = [1, 1, 1]} : vector<3x8x640xf32> to vector<1x8x640xf32>
    %246 = vector.shape_cast %245 : vector<1x8x640xf32> to vector<8x640xf32>
    %cst_52 = arith.constant -8.61472392E-4 : f32
    %247 = vector.broadcast %cst_52 : f32 to vector<8x640xf32>
    %248 = arith.mulf %246, %247 : vector<8x640xf32>
    %249 = arith.addf %244, %248 : vector<8x640xf32>
    %250 = vector.extract_strided_slice %213 {offsets = [2, 0, 0], sizes = [1, 8, 640], strides = [1, 1, 1]} : vector<3x8x640xf32> to vector<1x8x640xf32>
    %251 = vector.shape_cast %250 : vector<1x8x640xf32> to vector<8x640xf32>
    %cst_53 = arith.constant -0.00897746626 : f32
    %252 = vector.broadcast %cst_53 : f32 to vector<8x640xf32>
    %253 = arith.mulf %251, %252 : vector<8x640xf32>
    %254 = arith.addf %249, %253 : vector<8x640xf32>
    %c638_i32_54 = arith.constant 638 : i32
    %255 = tpu.dynamic_rotate %254 by %c638_i32_54 dim 1 : vector<8x640xf32>, i32 -> vector<8x640xf32>
    %256 = vector.extract_strided_slice %255 {offsets = [0, 0], sizes = [8, 512], strides = [1, 1]} : vector<8x640xf32> to vector<8x512xf32>
    %257 = arith.addf %240, %256 : vector<8x512xf32>
    %258 = vector.extract_strided_slice %213 {offsets = [0, 0, 0], sizes = [1, 8, 640], strides = [1, 1, 1]} : vector<3x8x640xf32> to vector<1x8x640xf32>
    %259 = vector.shape_cast %258 : vector<1x8x640xf32> to vector<8x640xf32>
    %cst_55 = arith.constant -0.0108616697 : f32
    %260 = vector.broadcast %cst_55 : f32 to vector<8x640xf32>
    %261 = arith.mulf %259, %260 : vector<8x640xf32>
    %262 = vector.extract_strided_slice %213 {offsets = [1, 0, 0], sizes = [1, 8, 640], strides = [1, 1, 1]} : vector<3x8x640xf32> to vector<1x8x640xf32>
    %263 = vector.shape_cast %262 : vector<1x8x640xf32> to vector<8x640xf32>
    %cst_56 = arith.constant 0.00169034046 : f32
    %264 = vector.broadcast %cst_56 : f32 to vector<8x640xf32>
    %265 = arith.mulf %263, %264 : vector<8x640xf32>
    %266 = arith.addf %261, %265 : vector<8x640xf32>
    %267 = vector.extract_strided_slice %213 {offsets = [2, 0, 0], sizes = [1, 8, 640], strides = [1, 1, 1]} : vector<3x8x640xf32> to vector<1x8x640xf32>
    %268 = vector.shape_cast %267 : vector<1x8x640xf32> to vector<8x640xf32>
    %cst_57 = arith.constant 0.0213740058 : f32
    %269 = vector.broadcast %cst_57 : f32 to vector<8x640xf32>
    %270 = arith.mulf %268, %269 : vector<8x640xf32>
    %271 = arith.addf %266, %270 : vector<8x640xf32>
    %c637_i32_58 = arith.constant 637 : i32
    %272 = tpu.dynamic_rotate %271 by %c637_i32_58 dim 1 : vector<8x640xf32>, i32 -> vector<8x640xf32>
    %273 = vector.extract_strided_slice %272 {offsets = [0, 0], sizes = [8, 512], strides = [1, 1]} : vector<8x640xf32> to vector<8x512xf32>
    %274 = arith.addf %257, %273 : vector<8x512xf32>
    %275 = vector.extract_strided_slice %213 {offsets = [0, 0, 0], sizes = [1, 8, 640], strides = [1, 1, 1]} : vector<3x8x640xf32> to vector<1x8x640xf32>
    %276 = vector.shape_cast %275 : vector<1x8x640xf32> to vector<8x640xf32>
    %cst_59 = arith.constant 0.025451893 : f32
    %277 = vector.broadcast %cst_59 : f32 to vector<8x640xf32>
    %278 = arith.mulf %276, %277 : vector<8x640xf32>
    %279 = vector.extract_strided_slice %213 {offsets = [1, 0, 0], sizes = [1, 8, 640], strides = [1, 1, 1]} : vector<3x8x640xf32> to vector<1x8x640xf32>
    %280 = vector.shape_cast %279 : vector<1x8x640xf32> to vector<8x640xf32>
    %cst_60 = arith.constant -0.00251341448 : f32
    %281 = vector.broadcast %cst_60 : f32 to vector<8x640xf32>
    %282 = arith.mulf %280, %281 : vector<8x640xf32>
    %283 = arith.addf %278, %282 : vector<8x640xf32>
    %284 = vector.extract_strided_slice %213 {offsets = [2, 0, 0], sizes = [1, 8, 640], strides = [1, 1, 1]} : vector<3x8x640xf32> to vector<1x8x640xf32>
    %285 = vector.shape_cast %284 : vector<1x8x640xf32> to vector<8x640xf32>
    %cst_61 = arith.constant -0.0467810147 : f32
    %286 = vector.broadcast %cst_61 : f32 to vector<8x640xf32>
    %287 = arith.mulf %285, %286 : vector<8x640xf32>
    %288 = arith.addf %283, %287 : vector<8x640xf32>
    %c636_i32_62 = arith.constant 636 : i32
    %289 = tpu.dynamic_rotate %288 by %c636_i32_62 dim 1 : vector<8x640xf32>, i32 -> vector<8x640xf32>
    %290 = vector.extract_strided_slice %289 {offsets = [0, 0], sizes = [8, 512], strides = [1, 1]} : vector<8x640xf32> to vector<8x512xf32>
    %291 = arith.addf %274, %290 : vector<8x512xf32>
    %292 = vector.extract_strided_slice %213 {offsets = [0, 0, 0], sizes = [1, 8, 640], strides = [1, 1, 1]} : vector<3x8x640xf32> to vector<1x8x640xf32>
    %293 = vector.shape_cast %292 : vector<1x8x640xf32> to vector<8x640xf32>
    %cst_63 = arith.constant -0.0594799332 : f32
    %294 = vector.broadcast %cst_63 : f32 to vector<8x640xf32>
    %295 = arith.mulf %293, %294 : vector<8x640xf32>
    %296 = vector.extract_strided_slice %213 {offsets = [1, 0, 0], sizes = [1, 8, 640], strides = [1, 1, 1]} : vector<3x8x640xf32> to vector<1x8x640xf32>
    %297 = vector.shape_cast %296 : vector<1x8x640xf32> to vector<8x640xf32>
    %cst_64 = arith.constant 0.00311387354 : f32
    %298 = vector.broadcast %cst_64 : f32 to vector<8x640xf32>
    %299 = arith.mulf %297, %298 : vector<8x640xf32>
    %300 = arith.addf %295, %299 : vector<8x640xf32>
    %301 = vector.extract_strided_slice %213 {offsets = [2, 0, 0], sizes = [1, 8, 640], strides = [1, 1, 1]} : vector<3x8x640xf32> to vector<1x8x640xf32>
    %302 = vector.shape_cast %301 : vector<1x8x640xf32> to vector<8x640xf32>
    %cst_65 = arith.constant 0.135345906 : f32
    %303 = vector.broadcast %cst_65 : f32 to vector<8x640xf32>
    %304 = arith.mulf %302, %303 : vector<8x640xf32>
    %305 = arith.addf %300, %304 : vector<8x640xf32>
    %c635_i32_66 = arith.constant 635 : i32
    %306 = tpu.dynamic_rotate %305 by %c635_i32_66 dim 1 : vector<8x640xf32>, i32 -> vector<8x640xf32>
    %307 = vector.extract_strided_slice %306 {offsets = [0, 0], sizes = [8, 512], strides = [1, 1]} : vector<8x640xf32> to vector<8x512xf32>
    %308 = arith.addf %291, %307 : vector<8x512xf32>
    %309 = vector.extract_strided_slice %213 {offsets = [0, 0, 0], sizes = [1, 8, 640], strides = [1, 1, 1]} : vector<3x8x640xf32> to vector<1x8x640xf32>
    %310 = vector.shape_cast %309 : vector<1x8x640xf32> to vector<8x640xf32>
    %cst_67 = arith.constant 0.271942794 : f32
    %311 = vector.broadcast %cst_67 : f32 to vector<8x640xf32>
    %312 = arith.mulf %310, %311 : vector<8x640xf32>
    %313 = vector.extract_strided_slice %213 {offsets = [1, 0, 0], sizes = [1, 8, 640], strides = [1, 1, 1]} : vector<3x8x640xf32> to vector<1x8x640xf32>
    %314 = vector.shape_cast %313 : vector<1x8x640xf32> to vector<8x640xf32>
    %cst_68 = arith.constant 3.300000e-01 : f32
    %315 = vector.broadcast %cst_68 : f32 to vector<8x640xf32>
    %316 = arith.mulf %314, %315 : vector<8x640xf32>
    %317 = arith.addf %312, %316 : vector<8x640xf32>
    %318 = vector.extract_strided_slice %213 {offsets = [2, 0, 0], sizes = [1, 8, 640], strides = [1, 1, 1]} : vector<3x8x640xf32> to vector<1x8x640xf32>
    %319 = vector.shape_cast %318 : vector<1x8x640xf32> to vector<8x640xf32>
    %cst_69 = arith.constant 0.271942794 : f32
    %320 = vector.broadcast %cst_69 : f32 to vector<8x640xf32>
    %321 = arith.mulf %319, %320 : vector<8x640xf32>
    %322 = arith.addf %317, %321 : vector<8x640xf32>
    %c634_i32_70 = arith.constant 634 : i32
    %323 = tpu.dynamic_rotate %322 by %c634_i32_70 dim 1 : vector<8x640xf32>, i32 -> vector<8x640xf32>
    %324 = vector.extract_strided_slice %323 {offsets = [0, 0], sizes = [8, 512], strides = [1, 1]} : vector<8x640xf32> to vector<8x512xf32>
    %325 = arith.addf %308, %324 : vector<8x512xf32>
    %326 = vector.extract_strided_slice %213 {offsets = [0, 0, 0], sizes = [1, 8, 640], strides = [1, 1, 1]} : vector<3x8x640xf32> to vector<1x8x640xf32>
    %327 = vector.shape_cast %326 : vector<1x8x640xf32> to vector<8x640xf32>
    %cst_71 = arith.constant 0.135345906 : f32
    %328 = vector.broadcast %cst_71 : f32 to vector<8x640xf32>
    %329 = arith.mulf %327, %328 : vector<8x640xf32>
    %330 = vector.extract_strided_slice %213 {offsets = [1, 0, 0], sizes = [1, 8, 640], strides = [1, 1, 1]} : vector<3x8x640xf32> to vector<1x8x640xf32>
    %331 = vector.shape_cast %330 : vector<1x8x640xf32> to vector<8x640xf32>
    %cst_72 = arith.constant 0.00311387354 : f32
    %332 = vector.broadcast %cst_72 : f32 to vector<8x640xf32>
    %333 = arith.mulf %331, %332 : vector<8x640xf32>
    %334 = arith.addf %329, %333 : vector<8x640xf32>
    %335 = vector.extract_strided_slice %213 {offsets = [2, 0, 0], sizes = [1, 8, 640], strides = [1, 1, 1]} : vector<3x8x640xf32> to vector<1x8x640xf32>
    %336 = vector.shape_cast %335 : vector<1x8x640xf32> to vector<8x640xf32>
    %cst_73 = arith.constant -0.0594799332 : f32
    %337 = vector.broadcast %cst_73 : f32 to vector<8x640xf32>
    %338 = arith.mulf %336, %337 : vector<8x640xf32>
    %339 = arith.addf %334, %338 : vector<8x640xf32>
    %c633_i32_74 = arith.constant 633 : i32
    %340 = tpu.dynamic_rotate %339 by %c633_i32_74 dim 1 : vector<8x640xf32>, i32 -> vector<8x640xf32>
    %341 = vector.extract_strided_slice %340 {offsets = [0, 0], sizes = [8, 512], strides = [1, 1]} : vector<8x640xf32> to vector<8x512xf32>
    %342 = arith.addf %325, %341 : vector<8x512xf32>
    %343 = vector.extract_strided_slice %213 {offsets = [0, 0, 0], sizes = [1, 8, 640], strides = [1, 1, 1]} : vector<3x8x640xf32> to vector<1x8x640xf32>
    %344 = vector.shape_cast %343 : vector<1x8x640xf32> to vector<8x640xf32>
    %cst_75 = arith.constant -0.0467810147 : f32
    %345 = vector.broadcast %cst_75 : f32 to vector<8x640xf32>
    %346 = arith.mulf %344, %345 : vector<8x640xf32>
    %347 = vector.extract_strided_slice %213 {offsets = [1, 0, 0], sizes = [1, 8, 640], strides = [1, 1, 1]} : vector<3x8x640xf32> to vector<1x8x640xf32>
    %348 = vector.shape_cast %347 : vector<1x8x640xf32> to vector<8x640xf32>
    %cst_76 = arith.constant -0.00251341448 : f32
    %349 = vector.broadcast %cst_76 : f32 to vector<8x640xf32>
    %350 = arith.mulf %348, %349 : vector<8x640xf32>
    %351 = arith.addf %346, %350 : vector<8x640xf32>
    %352 = vector.extract_strided_slice %213 {offsets = [2, 0, 0], sizes = [1, 8, 640], strides = [1, 1, 1]} : vector<3x8x640xf32> to vector<1x8x640xf32>
    %353 = vector.shape_cast %352 : vector<1x8x640xf32> to vector<8x640xf32>
    %cst_77 = arith.constant 0.025451893 : f32
    %354 = vector.broadcast %cst_77 : f32 to vector<8x640xf32>
    %355 = arith.mulf %353, %354 : vector<8x640xf32>
    %356 = arith.addf %351, %355 : vector<8x640xf32>
    %c632_i32_78 = arith.constant 632 : i32
    %357 = tpu.dynamic_rotate %356 by %c632_i32_78 dim 1 : vector<8x640xf32>, i32 -> vector<8x640xf32>
    %358 = vector.extract_strided_slice %357 {offsets = [0, 0], sizes = [8, 512], strides = [1, 1]} : vector<8x640xf32> to vector<8x512xf32>
    %359 = arith.addf %342, %358 : vector<8x512xf32>
    %360 = vector.extract_strided_slice %213 {offsets = [0, 0, 0], sizes = [1, 8, 640], strides = [1, 1, 1]} : vector<3x8x640xf32> to vector<1x8x640xf32>
    %361 = vector.shape_cast %360 : vector<1x8x640xf32> to vector<8x640xf32>
    %cst_79 = arith.constant 0.0213740058 : f32
    %362 = vector.broadcast %cst_79 : f32 to vector<8x640xf32>
    %363 = arith.mulf %361, %362 : vector<8x640xf32>
    %364 = vector.extract_strided_slice %213 {offsets = [1, 0, 0], sizes = [1, 8, 640], strides = [1, 1, 1]} : vector<3x8x640xf32> to vector<1x8x640xf32>
    %365 = vector.shape_cast %364 : vector<1x8x640xf32> to vector<8x640xf32>
    %cst_80 = arith.constant 0.00169034046 : f32
    %366 = vector.broadcast %cst_80 : f32 to vector<8x640xf32>
    %367 = arith.mulf %365, %366 : vector<8x640xf32>
    %368 = arith.addf %363, %367 : vector<8x640xf32>
    %369 = vector.extract_strided_slice %213 {offsets = [2, 0, 0], sizes = [1, 8, 640], strides = [1, 1, 1]} : vector<3x8x640xf32> to vector<1x8x640xf32>
    %370 = vector.shape_cast %369 : vector<1x8x640xf32> to vector<8x640xf32>
    %cst_81 = arith.constant -0.0108616697 : f32
    %371 = vector.broadcast %cst_81 : f32 to vector<8x640xf32>
    %372 = arith.mulf %370, %371 : vector<8x640xf32>
    %373 = arith.addf %368, %372 : vector<8x640xf32>
    %c631_i32_82 = arith.constant 631 : i32
    %374 = tpu.dynamic_rotate %373 by %c631_i32_82 dim 1 : vector<8x640xf32>, i32 -> vector<8x640xf32>
    %375 = vector.extract_strided_slice %374 {offsets = [0, 0], sizes = [8, 512], strides = [1, 1]} : vector<8x640xf32> to vector<8x512xf32>
    %376 = arith.addf %359, %375 : vector<8x512xf32>
    %377 = vector.extract_strided_slice %213 {offsets = [0, 0, 0], sizes = [1, 8, 640], strides = [1, 1, 1]} : vector<3x8x640xf32> to vector<1x8x640xf32>
    %378 = vector.shape_cast %377 : vector<1x8x640xf32> to vector<8x640xf32>
    %cst_83 = arith.constant -0.00897746626 : f32
    %379 = vector.broadcast %cst_83 : f32 to vector<8x640xf32>
    %380 = arith.mulf %378, %379 : vector<8x640xf32>
    %381 = vector.extract_strided_slice %213 {offsets = [1, 0, 0], sizes = [1, 8, 640], strides = [1, 1, 1]} : vector<3x8x640xf32> to vector<1x8x640xf32>
    %382 = vector.shape_cast %381 : vector<1x8x640xf32> to vector<8x640xf32>
    %cst_84 = arith.constant -8.61472392E-4 : f32
    %383 = vector.broadcast %cst_84 : f32 to vector<8x640xf32>
    %384 = arith.mulf %382, %383 : vector<8x640xf32>
    %385 = arith.addf %380, %384 : vector<8x640xf32>
    %386 = vector.extract_strided_slice %213 {offsets = [2, 0, 0], sizes = [1, 8, 640], strides = [1, 1, 1]} : vector<3x8x640xf32> to vector<1x8x640xf32>
    %387 = vector.shape_cast %386 : vector<1x8x640xf32> to vector<8x640xf32>
    %cst_85 = arith.constant 0.00362526067 : f32
    %388 = vector.broadcast %cst_85 : f32 to vector<8x640xf32>
    %389 = arith.mulf %387, %388 : vector<8x640xf32>
    %390 = arith.addf %385, %389 : vector<8x640xf32>
    %c630_i32_86 = arith.constant 630 : i32
    %391 = tpu.dynamic_rotate %390 by %c630_i32_86 dim 1 : vector<8x640xf32>, i32 -> vector<8x640xf32>
    %392 = vector.extract_strided_slice %391 {offsets = [0, 0], sizes = [8, 512], strides = [1, 1]} : vector<8x640xf32> to vector<8x512xf32>
    %393 = arith.addf %376, %392 : vector<8x512xf32>
    %394 = vector.extract_strided_slice %213 {offsets = [0, 0, 0], sizes = [1, 8, 640], strides = [1, 1, 1]} : vector<3x8x640xf32> to vector<1x8x640xf32>
    %395 = vector.shape_cast %394 : vector<1x8x640xf32> to vector<8x640xf32>
    %cst_87 = arith.constant 0.00264129974 : f32
    %396 = vector.broadcast %cst_87 : f32 to vector<8x640xf32>
    %397 = arith.mulf %395, %396 : vector<8x640xf32>
    %398 = vector.extract_strided_slice %213 {offsets = [1, 0, 0], sizes = [1, 8, 640], strides = [1, 1, 1]} : vector<3x8x640xf32> to vector<1x8x640xf32>
    %399 = vector.shape_cast %398 : vector<1x8x640xf32> to vector<8x640xf32>
    %cst_88 = arith.constant 2.44590978E-4 : f32
    %400 = vector.broadcast %cst_88 : f32 to vector<8x640xf32>
    %401 = arith.mulf %399, %400 : vector<8x640xf32>
    %402 = arith.addf %397, %401 : vector<8x640xf32>
    %403 = vector.extract_strided_slice %213 {offsets = [2, 0, 0], sizes = [1, 8, 640], strides = [1, 1, 1]} : vector<3x8x640xf32> to vector<1x8x640xf32>
    %404 = vector.shape_cast %403 : vector<1x8x640xf32> to vector<8x640xf32>
    %cst_89 = arith.constant -5.38223714E-4 : f32
    %405 = vector.broadcast %cst_89 : f32 to vector<8x640xf32>
    %406 = arith.mulf %404, %405 : vector<8x640xf32>
    %407 = arith.addf %402, %406 : vector<8x640xf32>
    %c629_i32_90 = arith.constant 629 : i32
    %408 = tpu.dynamic_rotate %407 by %c629_i32_90 dim 1 : vector<8x640xf32>, i32 -> vector<8x640xf32>
    %409 = vector.extract_strided_slice %408 {offsets = [0, 0], sizes = [8, 512], strides = [1, 1]} : vector<8x640xf32> to vector<8x512xf32>
    %410 = arith.addf %393, %409 : vector<8x512xf32>
    %411 = vector.extract_strided_slice %213 {offsets = [0, 0, 0], sizes = [1, 8, 640], strides = [1, 1, 1]} : vector<3x8x640xf32> to vector<1x8x640xf32>
    %412 = vector.shape_cast %411 : vector<1x8x640xf32> to vector<8x640xf32>
    %cst_91 = arith.constant -1.83017488E-4 : f32
    %413 = vector.broadcast %cst_91 : f32 to vector<8x640xf32>
    %414 = arith.mulf %412, %413 : vector<8x640xf32>
    %415 = vector.extract_strided_slice %213 {offsets = [1, 0, 0], sizes = [1, 8, 640], strides = [1, 1, 1]} : vector<3x8x640xf32> to vector<1x8x640xf32>
    %416 = vector.shape_cast %415 : vector<1x8x640xf32> to vector<8x640xf32>
    %cst_92 = arith.constant -8.17537966E-7 : f32
    %417 = vector.broadcast %cst_92 : f32 to vector<8x640xf32>
    %418 = arith.mulf %416, %417 : vector<8x640xf32>
    %419 = arith.addf %414, %418 : vector<8x640xf32>
    %c628_i32_93 = arith.constant 628 : i32
    %420 = tpu.dynamic_rotate %419 by %c628_i32_93 dim 1 : vector<8x640xf32>, i32 -> vector<8x640xf32>
    %421 = vector.extract_strided_slice %420 {offsets = [0, 0], sizes = [8, 512], strides = [1, 1]} : vector<8x640xf32> to vector<8x512xf32>
    %422 = arith.addf %410, %421 : vector<8x512xf32>
    %c0_94 = arith.constant 0 : index
    %c512_95 = arith.constant 512 : index
    %423 = vector.load %arg4[%c0_94, %c512_95] : memref<8x1024xf32, #tpu.memory_space<vmem>>, vector<8x512xf32>
    tpu.vector_store %arg4[%c0_94, %c512_95], %422 {strides = array<i32>} : memref<8x1024xf32, #tpu.memory_space<vmem>>, vector<8x512xf32>,
    return
  }
  func.func @transform_0(%arg0: i32, %arg1: i32) -> (i32, i32, i32) {
    %c0_i32 = arith.constant 0 : i32
    %c0_i32_0 = arith.constant 0 : i32
    return %c0_i32, %arg0, %arg1 : i32, i32, i32
  }
  func.func @transform_1(%arg0: i32, %arg1: i32) -> (i32, i32, i32) {
    %c1_i32 = arith.constant 1 : i32
    %0 = arith.addi %arg1, %c1_i32 : i32
    %c8_i32 = arith.constant 8 : i32
    %1 = arith.muli %0, %c8_i32 : i32
    %c0_i32 = arith.constant 0 : i32
    %c0_i32_0 = arith.constant 0 : i32
    return %c0_i32, %arg0, %1 : i32, i32, i32
  }
  func.func @transform_2(%arg0: i32, %arg1: i32) -> (i32, i32) {
    %c0_i32 = arith.constant 0 : i32
    return %arg0, %arg1 : i32, i32
  }
}

</mosaic_0001>

<bundles_post_ra>
// kernel: pesq_metric_forward.1
= control target key start
LH: loop header
LB: loop body
LE: loop exit
PB: predicated region body
PF: predicated region fallthrough
CT: control target
= control target key end

     0   :  { %s2378_s9 = smov 0   ;;  %s2380_s10 = smov 0   ;;  %s3890_s0 = inlined_call_operand.vmem [shape: f32[3,8,2176], index: 0, kind: input, shape index: {}, may-alias: {0,1}]   ;;  %s3891_s1 = inlined_call_operand.vmem [shape: f32[3,8,2176], index: 1, kind: input, shape index: {}, may-alias: {0,1}]   ;;  %s3892_s2 = inlined_call_operand.vmem [shape: f32[8,2048], index: 2, kind: output, shape index: {}]  }
   0x1   :  { %s2382_s11 = smov 0   ;;  %s2384_s12 = smov 0  }
   0x2   :  { %s2386_s13 = smov 0   ;;  %s2388_s14 = smov 0  }
   0x3   :  { %s2390_s15 = smov 0  }
   0x4 LB: > { %s21_s16 = sadd.s32 1, %s2312_s14  ;;  %s33_s17 = sadd.s32 1, %s2304_s12  ;;  %s2316_s15 = sphi %s2390_s15, %s12_s15   ;;  %s2312_s14 = sphi %s2388_s14, %s3990_s14   ;;  %s2308_s13 = sphi %s2386_s13, %s3989_s13   ;;  %s2304_s12 = sphi %s2384_s12, %s3988_s12   ;;  %s2300_s11 = sphi %s2382_s11, %s3987_s11   ;;  %s2296_s10 = sphi %s2380_s10, %s3986_s10   ;;  %s2292_s9 = sphi %s2378_s9, %s3985_s9  }
   0x5   : > { %p22_p0 = scmp.ge.s32.totalorder %s21_s16, 2  ;;  %p40_p1 = scmp.ne.s32.totalorder %s2304_s12, %s2300_s11 }
   0x6   : > { %p41_p2 = scmp.eq.s32.totalorder %s2316_s15, 0  ;;  %s1973_s18 = sshll.u32 %s2312_s14, 3 }
   0x7   : > { %s3992_s16 = smov (%p22_p0, %s21_s16), 0  ;;  %s1974_s20 = sadd.s32 8, %s1973_s18 }
   0x8   : > { %p2423_p3 = por %p41_p2, %p40_p1  ;;  %s29_s21 = ssub.s32 %s2312_s14, %s3992_s16 }
   0x9   : > { %s1975_s22 = sshll.u32 %s3992_s16, 3  ;;  %p31_p4 = scmp.eq.s32.totalorder %s29_s21, 0 }
   0xa   : > { %s1976_s23 = sadd.s32 8, %s1975_s22  ;;  %s65_s25 = sadd.s32 1, %s2296_s10 }
   0xb   : > { %s61_s24 = ssub.s32 %s1974_s20, %s1976_s23  ;;  %p72_p6 = scmp.ne.s32.totalorder %s2296_s10, %s2292_s9 }
   0xc   : > { %s2432_s26 = scalar_select %p31_p4, %s2304_s12, %s33_s17  }
   0xd   : > { %p63_p5 = scmp.eq.s32.totalorder %s61_s24, 0  ;;  %p2441_p7 = por %p72_p6, %p41_p2 }
   0xe   : > { %p1941_p8 = scmp.ge.s32.totalorder %s2316_s15, 2 }
   0xf   : > { %s2437_s27 = scalar_select %p63_p5, %s2296_s10, %s65_s25  }
  0x10   : > { %126 = sbr.rel (%p1941_p8) target bundleno = 94 (0x5e), region = 16 }
  0x15   : > { %129 = sbr.rel (!%p2423_p3) target bundleno = 88 (0x58), region = 20  ;;  %s131_s29 = sand.u32 (%p2423_p3), 1, %s2304_s12  }
  0x16   : > { %s1979_s30 = smul.u32 (%p2423_p3), 192, %s131_s29  ;;  %s1977_s3 = sshll.u32 (%p2423_p3), %s2312_s14, 6 }
  0x17   : > { %s2453_s6 = scalar_lea.vmem (%p2423_p3), %s3890_s0, %s1977_s3   ;;  %s2350_s8 = smov (%p2423_p3), 8  }
  0x18   : > { %s2455_s7 = scalar_lea.vmem (%p2423_p3), [#allocation2], %s1979_s30   ;;  %2183 = sdivrem.u32 (%p2423_p3), %s2350_s8, 24 }
  0x21   : > { %s2458_s17 = spop.drf %2183 }
  0x22   : > { %p1948_p9 = scmp.le.s32.totalorder %s2458_s17, 0 }
  0x23   : > { %s3909_s18 = smov (!%p1948_p9), %s2455_s7  ;;  %s3910_s19 = smov (!%p1948_p9), %s2453_s6 }
  0x24   : > { %1850 = sbr.rel (%p1948_p9) target bundleno = 63 (0x3f), region = 187  ;;  %s2467_s20 = smov (!%p1948_p9), 0  }
  0x25   : > { %s2469_s21 = smov (!%p1948_p9), 0  }
  0x29 LB: >> { %v272_v0 = vld [vmem:[%s2324_s19 + $0x110] sm:$0xff]  ;;  %v274_v1 = vld [vmem:[%s2324_s19 + $0x118] sm:$0xff]  ;;  %v276_v2 = vld [vmem:[%s2324_s19 + $0x120] sm:$0xff]  ;;  %s334_s22 = sadd.s32 1, %s2328_s20  ;;  %s184_s21 = sadd.s32 1, %s2332_s21   ;;  %s2332_s21 = sphi %s2469_s21, %s184_s21   ;;  %s2328_s20 = sphi %s2467_s20, %s3913_s20   ;;  %s2324_s19 = sphi %s3910_s19, %s3912_s19   ;;  %s2320_s18 = sphi %s3909_s18, %s3911_s18  }
  0x2a   : >> { %v278_v3 = vld [vmem:[%s2324_s19 + $0x128] sm:$0xff]  ;;  %v280_v4 = vld [vmem:[%s2324_s19 + $0x130] sm:$0xff]  ;;  %v282_v5 = vld [vmem:[%s2324_s19 + $0x138] sm:$0xff]  ;;  %287 = vst [vmem:[%s2320_s18 + $0x80] sm:$0xff] %v272_v0  ;;  %p335_p10 = scmp.ge.s32.totalorder %s334_s22, %s2458_s17  ;;  %p183_p11 = scmp.ge.s32.totalorder %s184_s21, %s2458_s17 }
  0x2b   : >> { %289 = vst [vmem:[%s2320_s18 + $0x88] sm:$0xff] %v274_v1  ;;  %291 = vst [vmem:[%s2320_s18 + $0x90] sm:$0xff] %v276_v2  ;;  %v284_v6 = vld [vmem:[%s2324_s19 + $0x140] sm:$0xff]  ;;  %v192_v8 = vld [vmem:[%s2324_s19 + $0x8] sm:$0xff] }
  0x2c   : >> { %v190_v7 = vld [vmem:[%s2324_s19] sm:$0xff]  ;;  %293 = vst [vmem:[%s2320_s18 + $0x98] sm:$0xff] %v278_v3  ;;  %295 = vst [vmem:[%s2320_s18 + $0xa0] sm:$0xff] %v280_v4  ;;  %v194_v9 = vld [vmem:[%s2324_s19 + $0x10] sm:$0xff]  ;;  %s3994_s22 = smov (%p335_p10, %s334_s22), 0 }
  0x2d   : >> { %297 = vst [vmem:[%s2320_s18 + $0xa8] sm:$0xff] %v282_v5  ;;  %191 = vst [vmem:[%s2320_s18] sm:$0xff] %v190_v7  ;;  %v196_v10 = vld [vmem:[%s2324_s19 + $0x18] sm:$0xff]  ;;  %v198_v11 = vld [vmem:[%s2324_s19 + $0x20] sm:$0xff]  ;;  %s337_s23 = smul.u32 192, %s3994_s22  ;;  %s3913_s20 = smov %s3994_s22 }
  0x2e   : >> { %193 = vst [vmem:[%s2320_s18 + $0x8] sm:$0xff] %v192_v8  ;;  %299 = vst [vmem:[%s2320_s18 + $0xb0] sm:$0xff] %v284_v6  ;;  %v200_v12 = vld [vmem:[%s2324_s19 + $0x28] sm:$0xff]  ;;  %v202_v13 = vld [vmem:[%s2324_s19 + $0x30] sm:$0xff] }
  0x2f   : >> { %195 = vst [vmem:[%s2320_s18 + $0x10] sm:$0xff] %v194_v9  ;;  %197 = vst [vmem:[%s2320_s18 + $0x18] sm:$0xff] %v196_v10  ;;  %v204_v14 = vld [vmem:[%s2324_s19 + $0x38] sm:$0xff]  ;;  %v238_v15 = vld [vmem:[%s2324_s19 + $0x88] sm:$0xff]  ;;  %s339_s24 = scalar_lea.vmem %s2453_s6, %s337_s23   ;;  %s340_s25 = scalar_lea.vmem %s2455_s7, %s337_s23 [#allocation2]  }
  0x30   : >> { %199 = vst [vmem:[%s2320_s18 + $0x20] sm:$0xff] %v198_v11  ;;  %201 = vst [vmem:[%s2320_s18 + $0x28] sm:$0xff] %v200_v12  ;;  %v240_v16 = vld [vmem:[%s2324_s19 + $0x90] sm:$0xff]  ;;  %v242_v17 = vld [vmem:[%s2324_s19 + $0x98] sm:$0xff] }
  0x31   : >> { %203 = vst [vmem:[%s2320_s18 + $0x30] sm:$0xff] %v202_v13  ;;  %205 = vst [vmem:[%s2320_s18 + $0x38] sm:$0xff] %v204_v14  ;;  %v244_v18 = vld [vmem:[%s2324_s19 + $0xa0] sm:$0xff]  ;;  %v246_v19 = vld [vmem:[%s2324_s19 + $0xa8] sm:$0xff] }
  0x32   : >> { %239 = vst [vmem:[%s2320_s18 + $0x40] sm:$0xff] %v238_v15  ;;  %241 = vst [vmem:[%s2320_s18 + $0x48] sm:$0xff] %v240_v16  ;;  %v248_v20 = vld [vmem:[%s2324_s19 + $0xb0] sm:$0xff]  ;;  %v250_v21 = vld [vmem:[%s2324_s19 + $0xb8] sm:$0xff] }
  0x33   : >> { %243 = vst [vmem:[%s2320_s18 + $0x50] sm:$0xff] %v242_v17  ;;  %245 = vst [vmem:[%s2320_s18 + $0x58] sm:$0xff] %v244_v18  ;;  %v252_v22 = vld [vmem:[%s2324_s19 + $0xc0] sm:$0xff]  ;;  %v300_v23 = vld [vmem:[%s2324_s19 + $0x148] sm:$0xff] }
  0x34   : >> { %247 = vst [vmem:[%s2320_s18 + $0x60] sm:$0xff] %v246_v19  ;;  %249 = vst [vmem:[%s2320_s18 + $0x68] sm:$0xff] %v248_v20  ;;  %v302_v24 = vld [vmem:[%s2324_s19 + $0x150] sm:$0xff]  ;;  %v304_v25 = vld [vmem:[%s2324_s19 + $0x158] sm:$0xff] }
  0x35   : >> { %251 = vst [vmem:[%s2320_s18 + $0x70] sm:$0xff] %v250_v21  ;;  %253 = vst [vmem:[%s2320_s18 + $0x78] sm:$0xff] %v252_v22  ;;  %v306_v26 = vld [vmem:[%s2324_s19 + $0x160] sm:$0xff]  ;;  %v308_v27 = vld [vmem:[%s2324_s19 + $0x168] sm:$0xff] }
  0x36   : >> { %301 = vst [vmem:[%s2320_s18 + $0xb8] sm:$0xff] %v300_v23  ;;  %303 = vst [vmem:[%s2320_s18 + $0xc0] sm:$0xff] %v302_v24  ;;  %v310_v28 = vld [vmem:[%s2324_s19 + $0x170] sm:$0xff]  ;;  %v312_v29 = vld [vmem:[%s2324_s19 + $0x178] sm:$0xff] }
  0x37   : >> { %305 = vst [vmem:[%s2320_s18 + $0xc8] sm:$0xff] %v304_v25  ;;  %307 = vst [vmem:[%s2320_s18 + $0xd0] sm:$0xff] %v306_v26  ;;  %v314_v30 = vld [vmem:[%s2324_s19 + $0x180] sm:$0xff]  ;;  %v316_v31 = vld [vmem:[%s2324_s19 + $0x188] sm:$0xff] }
  0x38   : >> { %309 = vst [vmem:[%s2320_s18 + $0xd8] sm:$0xff] %v308_v27  ;;  %311 = vst [vmem:[%s2320_s18 + $0xe0] sm:$0xff] %v310_v28  ;;  %v318_v32 = vld [vmem:[%s2324_s19 + $0x190] sm:$0xff]  ;;  %v320_v33 = vld [vmem:[%s2324_s19 + $0x198] sm:$0xff] }
  0x39   : >> { %313 = vst [vmem:[%s2320_s18 + $0xe8] sm:$0xff] %v312_v29  ;;  %315 = vst [vmem:[%s2320_s18 + $0xf0] sm:$0xff] %v314_v30  ;;  %v322_v34 = vld [vmem:[%s2324_s19 + $0x1a0] sm:$0xff]  ;;  %v324_v35 = vld [vmem:[%s2324_s19 + $0x1a8] sm:$0xff] }
  0x3a   : >> { %317 = vst [vmem:[%s2320_s18 + $0xf8] sm:$0xff] %v316_v31  ;;  %319 = vst [vmem:[%s2320_s18 + $0x100] sm:$0xff] %v318_v32  ;;  %v326_v36 = vld [vmem:[%s2324_s19 + $0x1b0] sm:$0xff]  ;;  %v328_v37 = vld [vmem:[%s2324_s19 + $0x1b8] sm:$0xff]  ;;  %186 = sbr.rel (!%p183_p11) target bundleno = 41 (0x29), region = 193 }
  0x3b   : >> { %321 = vst [vmem:[%s2320_s18 + $0x108] sm:$0xff] %v320_v33  ;;  %323 = vst [vmem:[%s2320_s18 + $0x110] sm:$0xff] %v322_v34  ;;  %v330_v38 = vld [vmem:[%s2324_s19 + $0x1c0] sm:$0xff]  ;;  %v332_v39 = vld [vmem:[%s2324_s19 + $0x1c8] sm:$0xff]  ;;  %s3912_s19 = smov %s339_s24 }
  0x3c   : >> { %325 = vst [vmem:[%s2320_s18 + $0x118] sm:$0xff] %v324_v35  ;;  %327 = vst [vmem:[%s2320_s18 + $0x120] sm:$0xff] %v326_v36 }
  0x3d   : >> { %329 = vst [vmem:[%s2320_s18 + $0x128] sm:$0xff] %v328_v37  ;;  %331 = vst [vmem:[%s2320_s18 + $0x130] sm:$0xff] %v330_v38 }
  0x3e   : >> { %333 = vst [vmem:[%s2320_s18 + $0x138] sm:$0xff] %v332_v39  ;;  %s3911_s18 = smov %s340_s25 }
  0x3f PF: > { %2185 = sdivrem.u32 %s2350_s8, 24 }
  0x40   : > { %s1949_s29 = smul.u32 3072, %s2458_s17 }
  0x42   : > { %s345_s30 = sshra.s32 %s1949_s29, 4 }
  0x43   : > { %s2584_s3 = scalar_lea.vmem %s2453_s6, %s345_s30   ;;  %s2587_s4 = scalar_lea.vmem %s2455_s7, %s345_s30 [#allocation2]  }
  0x48   : > { %s2589_s5 = spop.drf %2185 }
  0x49   : > { %p1951_p12 = scmp.le.s32.totalorder %s2589_s5, 0 }
  0x4a   : > { %s2334_s21 = smov (!%p1951_p12), %s2587_s4   ;;  %s2338_s18 = smov (!%p1951_p12), %s2584_s3  }
  0x4b   : > { %1864 = sbr.rel (%p1951_p12) target bundleno = 88 (0x58), region = 198  ;;  %s2342_s19 = smov (!%p1951_p12), 0  }
  0x4c   : > { %s2346_s20 = smov (!%p1951_p12), 0  }
  0x50 LB: >> { %v361_v40 = vld [vmem:[%s2340_s18] sm:$0xff]  ;;  %v363_v41 = vld [vmem:[%s2340_s18 + $0x88] sm:$0xff]  ;;  %v365_v42 = vld [vmem:[%s2340_s18 + $0x110] sm:$0xff]  ;;  %s367_s6 = sadd.s32 1, %s2344_s19  ;;  %s355_s20 = sadd.s32 1, %s2348_s20   ;;  %s2348_s20 = sphi %s2346_s20, %s355_s20   ;;  %s2344_s19 = sphi %s2342_s19, %s2343_s19   ;;  %s2340_s18 = sphi %s2338_s18, %s372_s18   ;;  %s2336_s21 = sphi %s2334_s21, %s373_s21  }
  0x51   : >> { %362 = vst [vmem:[%s2336_s21] sm:$0xff] %v361_v40  ;;  %364 = vst [vmem:[%s2336_s21 + $0x40] sm:$0xff] %v363_v41  ;;  %p368_p13 = scmp.ge.s32.totalorder %s367_s6, %s2589_s5  ;;  %p354_p0 = scmp.ge.s32.totalorder %s355_s20, %s2589_s5 }
  0x52   : >> { %366 = vst [vmem:[%s2336_s21 + $0x80] sm:$0xff] %v365_v42 }
  0x53   : >> { %s3996_s6 = smov (%p368_p13, %s367_s6), 0  ;;  %357 = sbr.rel (!%p354_p0) target bundleno = 80 (0x50), region = 204 }
  0x54   : >> { %s1952_s7 = sshll.u32 %s3996_s6, 3  ;;  %s2343_s19 = smov %s3996_s6  }
  0x55   : >> { %s372_s18 = scalar_lea.vmem %s2584_s3, %s1952_s7   ;;  %s373_s21 = scalar_lea.vmem %s2587_s4, %s1952_s7 [#allocation2]  }
  0x58 PF: > { %599 = sbr.rel (!%p2441_p7) target bundleno = 94 (0x5e), region = 86  ;;  %s601_s8 = sand.u32 (%p2441_p7), 1, %s2296_s10  }
  0x59   : > { %s1978_s17 = sshll.u32 (%p2441_p7), %s2312_s14, 6  ;;  %s1980_s22 = smul.u32 (%p2441_p7), 24, %s601_s8 }
  0x5a   : > { %s1807_s25 = scalar_lea.vmem (%p2441_p7), %s3891_s1, %s1978_s17 }
  0x5b   : > { %v1965_v43 = vld [vmem:[%s1807_s25 + $0x40] sm:$0xff] (%p2441_p7)  ;;  %v1966_v44 = vld [vmem:[%s1807_s25 + $0xc8] sm:$0xff] (%p2441_p7)  ;;  %v1967_v45 = vld [vmem:[%s1807_s25 + $0x150] sm:$0xff] (%p2441_p7)  ;;  %s603_s29 = scalar_lea.vmem (%p2441_p7), [#allocation3], %s1980_s22 }
  0x5c   : > { %643 = vst [vmem:[%s603_s29] sm:$0xff] (%p2441_p7), %v1965_v43  ;;  %645 = vst [vmem:[%s603_s29 + $0x8] sm:$0xff] (%p2441_p7), %v1966_v44 }
  0x5d   : > { %647 = vst [vmem:[%s603_s29 + $0x10] sm:$0xff] %v1967_v45 }
  0x5e PF: > { %p1968_p1 = scmp.ge.s32.totalorder %s2316_s15, 1  ;;  %p652_p2 = scmp.lt.s32.totalorder %s2316_s15, 3 }
  0x60   : > { %p653_p3 = pnand %p1968_p1, %p652_p2 }
  0x62   : > { %656 = sbr.rel (%p653_p3) target bundleno = 471 (0x1d7), region = 124 }
  0x67   : > { %s659_s28 = sand.u32 1, %s2300_s11   ;;  %s2351_s11 = smov 127  }
  0x68   : > { %s1981_s30 = smul.u32 192, %s659_s28  ;;  %s2352_s4 = smov 126  }
  0x69   : > { %s2353_s5 = smov 125   ;;  %s2354_s21 = smov 124  }
  0x6a   : > { %s2608_s3 = scalar_lea.vmem [#allocation2], %s1981_s30  ;;  %s2355_s18 = smov 123  }
  0x6b   : > { %v2611_v46 = vld [vmem:[%s2608_s3 + $0x10] sm:$0xff]  ;;  %v2625_v52 = vld [vmem:[%s2608_s3] sm:$0xff]  ;;  %v2641_v60 = vld [vmem:[%s2608_s3 + $0x18] sm:$0xff]  ;;  %s2356_s19 = smov 122   ;;  %s2357_s20 = smov 121  }
  0x6c   : > { %v2614_v47 = vld [vmem:[%s2608_s3 + $0x50] sm:$0xff]  ;;  %v742_v49 = vmul.f32 -0.0005382237, %v2611_v46  ;;  %v2628_v53 = vld [vmem:[%s2608_s3 + $0x40] sm:$0xff]  ;;  %v788_v55 = vmul.f32 0.0036252607, %v2611_v46 }
  0x6d   : > { %3914 = vst [vmem:[#allocation4_spill] sm:$0xff] %v2614_v47  ;;  %v2617_v48 = vld [vmem:[%s2608_s3 + $0x90] sm:$0xff]  ;;  %v2621_v50 = vmul.f32 0.00024459098, %v2614_v47  ;;  %v2631_v54 = vld [vmem:[%s2608_s3 + $0x80] sm:$0xff]  ;;  %v2644_v61 = vld [vmem:[%s2608_s3 + $0x58] sm:$0xff] }
  0x6e   : > { %v757_v51 = vmul.f32 0.0026412997, %v2617_v48  ;;  %v740_v57 = vmul.f32 -0.0005382237, %v2625_v52  ;;  %v2637_v58 = vmul.f32 0.00024459098, %v2628_v53 }
  0x6f   : > { %v752_v56 = vadd.f32 %v2621_v50, %v742_v49  ;;  %v755_v59 = vmul.f32 0.0026412997, %v2631_v54  ;;  %v2647_v62 = vld [vmem:[%s2608_s3 + $0x98] sm:$0xff]  ;;  %v786_v63 = vmul.f32 0.0036252607, %v2625_v52  ;;  %v2656_v4 = vld [vmem:[%s2608_s3 + $0x8] sm:$0xff] }
  0x70   : > { %v750_v1 = vadd.f32 %v2637_v58, %v740_v57  ;;  %v743_v2 = vmul.f32 -0.0005382237, %v2641_v60  ;;  %v2653_v3 = vmul.f32 0.00024459098, %v2644_v61  ;;  %v2659_v5 = vld [vmem:[%s2608_s3 + $0x48] sm:$0xff]  ;;  %v2667_v9 = vld [vmem:[%s2608_s3 + $0x20] sm:$0xff] }
  0x71   : > { %v762_v0 = vadd.f32 %v757_v51, %v752_v56  ;;  %v758_v6 = vmul.f32 0.0026412997, %v2647_v62  ;;  %v2663_v7 = vld [vmem:[%s2608_s3 + $0x88] sm:$0xff]  ;;  %v741_v8 = vmul.f32 -0.0005382237, %v2656_v4  ;;  %v2676_v14 = vld [vmem:[%s2608_s3 + $0x60] sm:$0xff] }
  0x72   : > { %v760_v10 = vadd.f32 %v755_v59, %v750_v1  ;;  %v753_v11 = vadd.f32 %v2653_v3, %v743_v2  ;;  %v2672_v12 = vmul.f32 0.00024459098, %v2659_v5  ;;  %v756_v13 = vmul.f32 0.0026412997, %v2663_v7  ;;  %v2679_v15 = vld [vmem:[%s2608_s3 + $0xa0] sm:$0xff]  ;;  %s2358_s6 = smov 120  }
  0x73   : > { %769 = vrot.lane.b32.xlu1 %v762_v0, %s2351_s11  ;;  %v2682_v16 = vmul.f32 -0.0008614724, %v2628_v53  ;;  %v801_v17 = vmul.f32 -0.008977466, %v2631_v54  ;;  %v744_v18 = vmul.f32 -0.0005382237, %v2667_v9 }
  0x74   : > { %765 = vrot.lane.b32.xlu0 %v760_v10, %s2351_s11  ;;  %v763_v19 = vadd.f32 %v758_v6, %v753_v11  ;;  %v751_v20 = vadd.f32 %v2672_v12, %v741_v8  ;;  %v2689_v21 = vmul.f32 0.00024459098, %v2676_v14  ;;  %v759_v22 = vmul.f32 0.0026412997, %v2679_v15  ;;  %s2359_s7 = smov 119   ;;  %s666_s8 = sand.u32 1, %s2292_s9  }
  0x75   : > { %v796_v23 = vadd.f32 %v2682_v16, %v786_v63  ;;  %v2694_v24 = vmul.f32 -0.0008614724, %v2614_v47  ;;  %v787_v25 = vmul.f32 0.0036252607, %v2656_v4  ;;  %v803_v28 = vmul.f32 -0.008977466, %v2617_v48 }
  0x76   : > { %v761_v26 = vadd.f32 %v756_v13, %v751_v20  ;;  %v754_v27 = vadd.f32 %v2689_v21, %v744_v18  ;;  %v2701_v29 = vmul.f32 -0.0008614724, %v2659_v5  ;;  %v790_v32 = vmul.f32 0.0036252607, %v2667_v9  ;;  %s2360_s17 = smov 118   ;;  %s1982_s9 = smul.u32 24, %s666_s8 }
  0x77   : > { %771 = vrot.lane.b32.xlu1 %v763_v19, %s2351_s11  ;;  %v806_v30 = vadd.f32 %v801_v17, %v796_v23  ;;  %v798_v31 = vadd.f32 %v2694_v24, %v788_v55  ;;  %v2706_v33 = vmul.f32 -0.0008614724, %v2676_v14  ;;  %v802_v36 = vmul.f32 -0.008977466, %v2663_v7  ;;  %s2361_s23 = smov 117   ;;  %s2362_s24 = smov 116  }
  0x78   : > { %767 = vrot.lane.b32.xlu0 %v761_v26, %s2351_s11  ;;  %v2709_v34 = vadd.f32 %v759_v22, %v754_v27  ;;  %v797_v35 = vadd.f32 %v2701_v29, %v787_v25  ;;  %v789_v37 = vmul.f32 0.0036252607, %v2641_v60  ;;  %v805_v38 = vmul.f32 -0.008977466, %v2679_v15  ;;  %s668_s22 = scalar_lea.vmem [#allocation3], %s1982_s9  ;;  %s1969_s25 = sshll.u32 %s2308_s13, 3 }
  0x79   : > { %v2716_v39 = vmul.f32 -0.0008614724, %v2644_v61  ;;  %v808_v40 = vadd.f32 %v803_v28, %v798_v31  ;;  %v800_v41 = vadd.f32 %v2706_v33, %v790_v32  ;;  %v831_v42 = vmul.f32 -0.01086167, %v2656_v4  ;;  %p3643_p4 = scmp.lt.s32.totalorder %s1969_s25, 15 }
  0x7a   : > { %3915 = vst [vmem:[#allocation5_spill] sm:$0xff] %v2709_v34  ;;  %v2722_v43 = vmul.f32 0.0016903405, %v2659_v5  ;;  %v804_v44 = vmul.f32 -0.008977466, %v2647_v62  ;;  %v807_v45 = vadd.f32 %v802_v36, %v797_v35 }
  0x7b   : > { %811 = vrot.lane.b32.xlu1 %v806_v30, %s2352_s4  ;;  %v799_v49 = vadd.f32 %v2716_v39, %v789_v37  ;;  %v830_v51 = vmul.f32 -0.01086167, %v2625_v52  ;;  %v2730_v55 = vmul.f32 0.0016903405, %v2628_v53  ;;  %v846_v56 = vmul.f32 0.021374006, %v2663_v7 }
  0x7c   : > { %773 = vrot.lane.b32.xlu0 %v2709_v34, %s2351_s11  ;;  %v2734_v57 = vadd.f32 %v805_v38, %v800_v41  ;;  %v841_v59 = vadd.f32 %v2722_v43, %v831_v42  ;;  %v833_v63 = vmul.f32 -0.01086167, %v2641_v60  ;;  %v2739_v0 = vmul.f32 0.0016903405, %v2644_v61  ;;  %s3998_s25 = smov (!%p3643_p4, %s1969_s25), 15 }
  0x7d   : > { %v845_v1 = vmul.f32 0.021374006, %v2631_v54  ;;  %v809_v2 = vadd.f32 %v804_v44, %v799_v49  ;;  %v840_v6 = vadd.f32 %v2730_v55, %v830_v51  ;;  %v832_v8 = vmul.f32 -0.01086167, %v2611_v46  ;;  %s1970_s13 = sshll.u32 %s3998_s25, 3 }
  0x7e   : > { %3916 = vst [vmem:[#allocation6_spill] sm:$0xff] %v2734_v57  ;;  %v2746_v10 = vmul.f32 0.0016903405, %v2614_v47  ;;  %v848_v11 = vmul.f32 0.021374006, %v2647_v62  ;;  %v851_v13 = vadd.f32 %v846_v56, %v841_v59  ;;  %v843_v17 = vadd.f32 %v2739_v0, %v833_v63 }
  0x7f   : > { %815 = vrot.lane.b32.xlu1 %v808_v40, %s2352_s4  ;;  %v874_v18 = vmul.f32 0.025451893, %v2625_v52  ;;  %v2754_v19 = vmul.f32 -0.0025134145, %v2628_v53  ;;  %v847_v20 = vmul.f32 0.021374006, %v2617_v48  ;;  %v850_v22 = vadd.f32 %v845_v1, %v840_v6 }
  0x80   : > { %813 = vrot.lane.b32.xlu0 %v807_v45, %s2352_s4  ;;  %v842_v23 = vadd.f32 %v2746_v10, %v832_v8  ;;  %v834_v25 = vmul.f32 -0.01086167, %v2667_v9  ;;  %v2761_v26 = vmul.f32 0.0016903405, %v2676_v14  ;;  %v889_v27 = vmul.f32 -0.046781015, %v2631_v54 }
  0x81   : > { %v853_v28 = vadd.f32 %v848_v11, %v843_v17  ;;  %v884_v30 = vadd.f32 %v2754_v19, %v874_v18  ;;  %v876_v31 = vmul.f32 0.025451893, %v2611_v46  ;;  %v2768_v32 = vmul.f32 -0.0025134145, %v2614_v47 }
  0x82   : > { %v849_v35 = vmul.f32 0.021374006, %v2679_v15  ;;  %v852_v36 = vadd.f32 %v847_v20, %v842_v23  ;;  %v844_v37 = vadd.f32 %v2761_v26, %v834_v25  ;;  %v875_v38 = vmul.f32 0.025451893, %v2656_v4 }
  0x83   : > { %819 = vrot.lane.b32.xlu1 %v2734_v57, %s2352_s4  ;;  %v2775_v40 = vmul.f32 -0.0025134145, %v2659_v5  ;;  %v891_v41 = vmul.f32 -0.046781015, %v2617_v48  ;;  %v894_v42 = vadd.f32 %v889_v27, %v884_v30  ;;  %v886_v44 = vadd.f32 %v2768_v32, %v876_v31 }
  0x84   : > { %817 = vrot.lane.b32.xlu0 %v809_v2, %s2352_s4  ;;  %v878_v45 = vmul.f32 0.025451893, %v2667_v9  ;;  %v2782_v49 = vmul.f32 -0.0025134145, %v2676_v14  ;;  %v890_v51 = vmul.f32 -0.046781015, %v2663_v7  ;;  %v2786_v56 = vadd.f32 %v849_v35, %v844_v37 }
  0x85   : > { %v885_v59 = vadd.f32 %v2775_v40, %v875_v38  ;;  %v877_v63 = vmul.f32 0.025451893, %v2641_v60  ;;  %v2791_v1 = vmul.f32 -0.0025134145, %v2644_v61  ;;  %v893_v2 = vmul.f32 -0.046781015, %v2679_v15 }
  0x86   : > { %3917 = vst [vmem:[#allocation7_spill] sm:$0xff] %v2786_v56  ;;  %v896_v6 = vadd.f32 %v891_v41, %v886_v44  ;;  %v888_v8 = vadd.f32 %v2782_v49, %v878_v45  ;;  %v919_v11 = vmul.f32 -0.059479933, %v2656_v4  ;;  %v892_v17 = vmul.f32 -0.046781015, %v2647_v62 }
  0x87   : > { %857 = vrot.lane.b32.xlu1 %v851_v13, %s2353_s5  ;;  %v2798_v13 = vmul.f32 0.0031138735, %v2659_v5  ;;  %v895_v18 = vadd.f32 %v890_v51, %v885_v59  ;;  %v887_v20 = vadd.f32 %v2791_v1, %v877_v63  ;;  %v2806_v23 = vmul.f32 0.0031138735, %v2628_v53 }
  0x88   : > { %855 = vrot.lane.b32.xlu0 %v850_v22, %s2353_s5  ;;  %v918_v22 = vmul.f32 -0.059479933, %v2625_v52  ;;  %v934_v25 = vmul.f32 0.1353459, %v2663_v7  ;;  %v2810_v27 = vadd.f32 %v893_v2, %v888_v8  ;;  %v921_v30 = vmul.f32 -0.059479933, %v2641_v60 }
  0x89   : > { %v2815_v31 = vmul.f32 0.0031138735, %v2644_v61  ;;  %v933_v35 = vmul.f32 0.1353459, %v2631_v54  ;;  %v920_v38 = vmul.f32 -0.059479933, %v2611_v46 }
  0x8a   : > { %3918 = vst [vmem:[#allocation8_spill] sm:$0xff] %v2810_v27  ;;  %v928_v37 = vadd.f32 %v2806_v23, %v918_v22  ;;  %v2822_v41 = vmul.f32 0.0031138735, %v2614_v47  ;;  %v967_v44 = vmul.f32 0.33, %v2628_v53 }
  0x8b   : > { %861 = vrot.lane.b32.xlu1 %v853_v28, %s2353_s5  ;;  %v929_v28 = vadd.f32 %v2798_v13, %v919_v11  ;;  %v931_v51 = vadd.f32 %v2815_v31, %v921_v30  ;;  %v936_v59 = vmul.f32 0.1353459, %v2647_v62  ;;  %v935_v63 = vmul.f32 0.1353459, %v2617_v48 }
  0x8c   : > { %859 = vrot.lane.b32.xlu0 %v852_v36, %s2353_s5  ;;  %v897_v36 = vadd.f32 %v892_v17, %v887_v20  ;;  %v938_v2 = vadd.f32 %v933_v35, %v928_v37  ;;  %v922_v8 = vmul.f32 -0.059479933, %v2667_v9  ;;  %v2835_v11 = vmul.f32 0.0031138735, %v2676_v14 }
  0x8d   : > { %v939_v45 = vadd.f32 %v934_v25, %v929_v28  ;;  %v964_v20 = vmul.f32 0.2719428, %v2611_v46  ;;  %v1046_v22 = vmul.f32 -0.046781015, %v2656_v4  ;;  %v941_v25 = vadd.f32 %v936_v59, %v931_v51 }
  0x8e   : > { %v969_v28 = vmul.f32 0.33, %v2614_v47  ;;  %v963_v30 = vmul.f32 0.2719428, %v2656_v4  ;;  %v1056_v35 = vmul.f32 0.025451893, %v2663_v7 }
  0x8f   : > { %899 = vrot.lane.b32.xlu1 %v894_v42, %s2354_s21  ;;  %v962_v42 = vmul.f32 0.2719428, %v2625_v52  ;;  %v966_v37 = vmul.f32 0.2719428, %v2667_v9  ;;  %v937_v51 = vmul.f32 0.1353459, %v2679_v15 }
  0x90   : > { %863 = vrot.lane.b32.xlu0 %v2786_v56, %s2353_s5  ;;  %v1085_v59 = vmul.f32 0.021374006, %v2656_v4  ;;  %v979_v56 = vmul.f32 0.2719428, %v2617_v48  ;;  %v1095_v34 = vmul.f32 -0.01086167, %v2663_v7  ;;  %v974_v47 = vadd.f32 %v969_v28, %v964_v20 }
  0x91   : > { %v972_v17 = vadd.f32 %v967_v44, %v962_v42  ;;  %v1051_v42 = vadd.f32 %v1046_v22, %v2775_v40  ;;  %v965_v40 = vmul.f32 0.2719428, %v2641_v60  ;;  %v1123_v20 = vmul.f32 -0.008977466, %v2625_v52 }
  0x92   : > { %v1006_v28 = vmul.f32 0.1353459, %v2625_v52 }
  0x93   : > { %903 = vrot.lane.b32.xlu1 %v896_v6, %s2354_s21  ;;  %v930_v6 = vadd.f32 %v2822_v41, %v920_v38  ;;  %v971_v38 = vmul.f32 0.33, %v2676_v14  ;;  %v2853_v57 = vadd.f32 %v1056_v35, %v1051_v42  ;;  %v1007_v35 = vmul.f32 0.1353459, %v2656_v4 }
  0x94   : > { %901 = vrot.lane.b32.xlu0 %v895_v18, %s2354_s21  ;;  %v977_v18 = vmul.f32 0.2719428, %v2631_v54 }
  0x95   : > { %v940_v44 = vadd.f32 %v935_v63, %v930_v6  ;;  %v970_v63 = vmul.f32 0.33, %v2644_v61  ;;  %v976_v22 = vadd.f32 %v971_v38, %v966_v37  ;;  %v2873_v37 = vadd.f32 %v1123_v20, %v2682_v16 }
  0x96   : > { %v1011_v16 = vadd.f32 %v1006_v28, %v2806_v23  ;;  %v1165_v28 = vmul.f32 0.0026412997, %v2641_v60 }
  0x97   : > { %907 = vrot.lane.b32.xlu1 %v2810_v27, %s2354_s21  ;;  %v982_v27 = vadd.f32 %v977_v18, %v972_v17  ;;  %v981_v17 = vmul.f32 0.2719428, %v2679_v15 }
  0x98   : > { %905 = vrot.lane.b32.xlu0 %v897_v36, %s2354_s21  ;;  %v968_v36 = vmul.f32 0.33, %v2659_v5 }
  0x99   : > { %v2875_v42 = vadd.f32 %v981_v17, %v976_v22  ;;  %v1173_v22 = vmul.f32 -0.0005382237, %v2663_v7  ;;  %v1162_v17 = vmul.f32 0.0026412997, %v2625_v52 }
  0x9a   : > { %v973_v6 = vadd.f32 %v968_v36, %v963_v30  ;;  %v975_v30 = vadd.f32 %v970_v63, %v965_v40  ;;  %v980_v36 = vmul.f32 0.2719428, %v2647_v62  ;;  %v1126_v40 = vmul.f32 -0.008977466, %v2641_v60 }
  0x9b   : > { %945 = vrot.lane.b32.xlu1 %v939_v45, %s2355_s18  ;;  %v932_v45 = vadd.f32 %v2835_v11, %v922_v8  ;;  %v978_v8 = vmul.f32 0.2719428, %v2663_v7 }
  0x9c   : > { %943 = vrot.lane.b32.xlu0 %v938_v2, %s2355_s18  ;;  %v1090_v2 = vadd.f32 %v1085_v59, %v2722_v43  ;;  %v984_v43 = vadd.f32 %v979_v56, %v974_v47  ;;  %v1009_v47 = vmul.f32 0.1353459, %v2641_v60  ;;  %v1124_v56 = vmul.f32 -0.008977466, %v2656_v4 }
  0x9d   : > { %v2863_v18 = vadd.f32 %v937_v51, %v932_v45  ;;  %v983_v38 = vadd.f32 %v978_v8, %v973_v6  ;;  %v1012_v45 = vadd.f32 %v1007_v35, %v2798_v13  ;;  %v1019_v51 = vmul.f32 -0.059479933, %v2647_v62 }
  0x9e   : > { %v1127_v59 = vmul.f32 -0.008977466, %v2667_v9  ;;  %v985_v63 = vadd.f32 %v980_v36, %v975_v30  ;;  %v1129_v13 = vadd.f32 %v1124_v56, %v2701_v29  ;;  %v1163_v6 = vmul.f32 0.0026412997, %v2656_v4 }
  0x9f   : > { %949 = vrot.lane.b32.xlu1 %v941_v25, %s2355_s18  ;;  %v2866_v25 = vadd.f32 %v1095_v34, %v1090_v2  ;;  %v1017_v34 = vmul.f32 -0.059479933, %v2663_v7  ;;  %v1008_v2 = vmul.f32 0.1353459, %v2611_v46  ;;  %v2897_v23 = vadd.f32 %v1126_v40, %v2716_v39 }
  0xa0   : > { %947 = vrot.lane.b32.xlu0 %v940_v44, %s2355_s18  ;;  %v1016_v44 = vmul.f32 -0.059479933, %v2631_v54  ;;  %v2894_v8 = vadd.f32 %v1127_v59, %v2706_v33  ;;  %v1014_v35 = vadd.f32 %v1009_v47, %v2815_v31  ;;  %v1168_v29 = vadd.f32 %v1163_v6, %v2672_v12 }
  0xa1   : > { %v1018_v33 = vmul.f32 -0.059479933, %v2617_v48  ;;  %v1022_v39 = vadd.f32 %v1017_v34, %v1012_v45  ;;  %v1045_v30 = vmul.f32 -0.046781015, %v2625_v52  ;;  %v2917_v31 = vadd.f32 %v1165_v28, %v2653_v3 }
  0xa2   : > { %v2914_v36 = vadd.f32 %v1173_v22, %v1168_v29  ;;  %v2920_v12 = vmul.f32 -8.1753797e-07, %v2628_v53  ;;  %v1201_v47 = vmul.f32 -0.00018301749, %v2625_v52  ;;  %v1024_v56 = vadd.f32 %v1019_v51, %v1014_v35 }
  0xa3   : > { %987 = vrot.lane.b32.xlu1 %v982_v27, %s2356_s19  ;;  %v1134_v27 = vmul.f32 0.0036252607, %v2663_v7  ;;  %v1013_v34 = vadd.f32 %v1008_v2, %v2822_v41  ;;  %v1055_v45 = vmul.f32 0.025451893, %v2631_v54  ;;  %v1047_v3 = vmul.f32 -0.046781015, %v2611_v46 }
  0xa4   : > { %951 = vrot.lane.b32.xlu0 %v2863_v18, %s2355_s18  ;;  %v1050_v51 = vadd.f32 %v1045_v30, %v2754_v19  ;;  %v1202_v41 = vmul.f32 -0.00018301749, %v2656_v4  ;;  %v2940_v59 = vmul.f32 -8.1753797e-07, %v2676_v14  ;;  %v1205_v40 = vmul.f32 -0.00018301749, %v2667_v9 }
  0xa5   : > { %v2903_v20 = vadd.f32 %v1134_v27, %v1129_v13  ;;  %v1010_v27 = vmul.f32 0.1353459, %v2667_v9  ;;  %v2945_v2 = vmul.f32 -8.1753797e-07, %v2644_v61  ;;  %v733_v6 = vmul.f32 -0.00018301749, %v2663_v7 }
  0xa6   : > { %3919 = vst [vmem:[#allocation9_spill] sm:$0xff] %v2940_v59  ;;  %v2953_v4 = vadd.f32 %v1205_v40, %v2940_v59  ;;  %v1060_v61 = vadd.f32 %v1055_v45, %v1050_v51  ;;  %v1052_v22 = vadd.f32 %v1047_v3, %v2768_v32  ;;  %v1049_v35 = vmul.f32 -0.046781015, %v2667_v9 }
  0xa7   : > { %991 = vrot.lane.b32.xlu1 %v984_v43, %s2356_s19  ;;  %v2909_v43 = vadd.f32 %v1162_v17, %v2637_v58  ;;  %v1166_v58 = vmul.f32 0.0026412997, %v2667_v9  ;;  %3920 = vst [vmem:[#allocation10_spill] sm:$0xff] %v2945_v2  ;;  %v1015_v13 = vadd.f32 %v1010_v27, %v2835_v11  ;;  %v1057_v17 = vmul.f32 0.025451893, %v2617_v48 }
  0xa8   : > { %989 = vrot.lane.b32.xlu0 %v983_v38, %s2356_s19  ;;  %v1021_v38 = vadd.f32 %v1016_v44, %v1011_v16  ;;  %v2930_v44 = vadd.f32 %v1201_v47, %v2920_v12  ;;  %v728_v16 = vmul.f32 -8.1753797e-07, %v2659_v5  ;;  %v1023_v5 = vadd.f32 %v1018_v33, %v1013_v34  ;;  %3921 = vst [vmem:[#allocation11_spill] sm:$0xff] %v2953_v4 }
  0xa9   : > { %v2933_v53 = vadd.f32 %v1166_v58, %v2689_v21  ;;  %v1204_v21 = vmul.f32 -0.00018301749, %v2641_v60  ;;  %v1048_v28 = vmul.f32 -0.046781015, %v2641_v60  ;;  %v1062_v7 = vadd.f32 %v1057_v17, %v1052_v22 }
  0xaa   : > { %v2950_v19 = vadd.f32 %v1202_v41, %v728_v16  ;;  %v2963_v11 = vadd.f32 %v733_v6, %v728_v16  ;;  %v1054_v33 = vadd.f32 %v1049_v35, %v2782_v49  ;;  %v1059_v32 = vmul.f32 0.025451893, %v2679_v15 }
  0xab   : > { %995 = vrot.lane.b32.xlu1 %v2875_v42, %s2356_s19  ;;  %v2956_v14 = vadd.f32 %v1204_v21, %v2945_v2  ;;  %v1058_v30 = vmul.f32 0.025451893, %v2647_v62  ;;  %v1087_v58 = vmul.f32 0.021374006, %v2641_v60  ;;  %v1094_v34 = vmul.f32 -0.01086167, %v2631_v54 }
  0xac   : > { %993 = vrot.lane.b32.xlu0 %v985_v63, %s2356_s19  ;;  %v1020_v63 = vmul.f32 -0.059479933, %v2679_v15  ;;  %3922 = vst [vmem:[#allocation12_spill] sm:$0xff] %v2963_v11  ;;  %v2978_v47 = vadd.f32 %v1059_v32, %v1054_v33  ;;  %v1097_v45 = vmul.f32 -0.01086167, %v2647_v62  ;;  %v3038_v32 = vld [vmem:[%s2608_s3 + $0x38] sm:$0xff] }
  0xad   : > { %v1125_v16 = vmul.f32 -0.008977466, %v2611_v46  ;;  %v1098_v41 = vmul.f32 -0.01086167, %v2679_v15  ;;  %v1135_v40 = vmul.f32 0.0036252607, %v2617_v48 }
  0xae   : > { %v2966_v29 = vadd.f32 %v1020_v63, %v1015_v13  ;;  %v1164_v21 = vmul.f32 0.0026412997, %v2611_v46  ;;  %v1136_v13 = vmul.f32 0.0036252607, %v2647_v62  ;;  %v1172_v6 = vmul.f32 -0.0005382237, %v2631_v54 }
  0xaf   : > { %1028 = vrot.lane.b32.xlu1 %v1022_v39, %s2357_s20  ;;  %v1053_v39 = vadd.f32 %v1048_v28, %v2791_v1  ;;  %v1086_v1 = vmul.f32 0.021374006, %v2611_v46  ;;  %v1175_v17 = vmul.f32 -0.0005382237, %v2647_v62  ;;  %v1174_v28 = vmul.f32 -0.0005382237, %v2617_v48 }
  0xb0   : > { %1026 = vrot.lane.b32.xlu0 %v1021_v38, %s2357_s20  ;;  %v1084_v38 = vmul.f32 0.021374006, %v2625_v52  ;;  %v1092_v52 = vadd.f32 %v1087_v58, %v2739_v0  ;;  %v1133_v0 = vmul.f32 0.0036252607, %v2631_v54  ;;  %v1169_v35 = vadd.f32 %v1164_v21, %v2621_v50  ;;  %v3924_v62 = vld [vmem:[#allocation4_spill] sm:$0xff] }
  0xb1   : > { %v1063_v49 = vadd.f32 %v1058_v30, %v1053_v39  ;;  %v1091_v27 = vadd.f32 %v1086_v1, %v2746_v10  ;;  %v1176_v54 = vmul.f32 -0.0005382237, %v2679_v15  ;;  %v3041_v39 = vld [vmem:[%s2608_s3 + $0x78] sm:$0xff]  ;;  %v3047_v50 = vmul.f32 -8.1753797e-07, %v3924_v62  ;;  %v3054_v58 = vld [vmem:[%s2608_s3 + $0x70] sm:$0xff] }
  0xb2   : > { %v1102_v3 = vadd.f32 %v1097_v45, %v1092_v52  ;;  %v3044_v30 = vld [vmem:[%s2608_s3 + $0xb8] sm:$0xff]  ;;  %v1180_v1 = vadd.f32 %v1175_v17, %v2917_v31  ;;  %v1265_v52 = vmul.f32 -0.0005382237, %v3038_v32  ;;  %v3068_v45 = vmul.f32 0.00024459098, %v3041_v39 }
  0xb3   : > { %1032 = vrot.lane.b32.xlu1 %v1024_v56, %s2357_s20  ;;  %v1089_v56 = vadd.f32 %v1084_v38, %v2730_v55  ;;  %v1088_v55 = vmul.f32 0.021374006, %v2667_v9  ;;  %v1138_v9 = vadd.f32 %v1133_v0, %v2873_v37  ;;  %3925 = vst [vmem:[#allocation4_spill] sm:$0xff] %v3047_v50  ;;  %v3051_v38 = vld [vmem:[%s2608_s3 + $0x30] sm:$0xff]  ;;  %v3099_v0 = vld [vmem:[%s668_s22] sm:$0xff] }
  0xb4   : > { %1030 = vrot.lane.b32.xlu0 %v1023_v5, %s2357_s20  ;;  %v3011_v5 = vld [vmem:[%s2608_s3 + $0x28] sm:$0xff]  ;;  %v1264_v31 = vmul.f32 -0.0005382237, %v3051_v38 }
  0xb5   : > { %v1099_v60 = vadd.f32 %v1094_v34, %v1089_v56  ;;  %v1093_v10 = vadd.f32 %v1088_v55, %v2761_v26  ;;  %v3014_v26 = vld [vmem:[%s2608_s3 + $0x68] sm:$0xff]  ;;  %v3063_v34 = vld [vmem:[%s2608_s3 + $0xb0] sm:$0xff]  ;;  %v3091_v55 = vmul.f32 -0.0008614724, %v3054_v58 }
  0xb6   : > { %v3024_v22 = vmul.f32 0.00024459098, %v3014_v26  ;;  %v1570_v21 = vmul.f32 0.025451893, %v3063_v34 }
  0xb7   : > { %1065 = vrot.lane.b32.xlu1 %v1060_v61, %s2358_s6  ;;  %v3007_v63 = vadd.f32 %v1098_v41, %v1093_v10  ;;  %v1263_v61 = vmul.f32 -0.0005382237, %v3011_v5  ;;  %v3108_v10 = vmul.f32 0.0016903405, %v3041_v39  ;;  %v3111_v41 = vadd.f32 %v3068_v45, %v1265_v52 }
  0xb8   : > { %1034 = vrot.lane.b32.xlu0 %v2966_v29, %s2357_s20  ;;  %v1597_v52 = vmul.f32 0.021374006, %v3011_v5 }
  0xbb   : > { %1069 = vrot.lane.b32.xlu1 %v1062_v7, %s2358_s6  ;;  %v3030_v7 = vld [vmem:[%s2608_s3 + $0xa8] sm:$0xff] }
  0xbc   : > { %1067 = vrot.lane.b32.xlu0 %v2853_v57, %s2358_s6  ;;  %v1096_v57 = vmul.f32 -0.01086167, %v2617_v48  ;;  %v1203_v48 = vmul.f32 -0.00018301749, %v2611_v46  ;;  %v1278_v56 = vmul.f32 0.0026412997, %v3030_v7  ;;  %v1179_v46 = vadd.f32 %v1174_v28, %v1169_v35 }
  0xbd   : > { %v1569_v35 = vmul.f32 0.025451893, %v3030_v7  ;;  %v3140_v28 = vmul.f32 -0.0025134145, %v3041_v39  ;;  %v1645_v11 = vmul.f32 0.0036252607, %v3030_v7 }
  0xbe   : > { %v1101_v51 = vadd.f32 %v1096_v57, %v1091_v27  ;;  %v3085_v27 = vadd.f32 %v1203_v48, %v3047_v50  ;;  %v3088_v57 = vmul.f32 0.0026412997, %v3063_v34  ;;  %v1561_v48 = vmul.f32 -0.046781015, %v3038_v32 }
  0xbf   : > { %1073 = vrot.lane.b32.xlu1 %v2978_v47, %s2358_s6 }
  0xc0   : > { %1071 = vrot.lane.b32.xlu0 %v1063_v49, %s2358_s6  ;;  %v1273_v49 = vadd.f32 %v3024_v22, %v1263_v61 }
  0xc3   : > { %1106 = vrot.lane.b32.xlu1 %v2866_v25, %s2359_s7  ;;  %v1130_v25 = vadd.f32 %v1125_v16, %v2694_v24  ;;  %v1137_v24 = vmul.f32 0.0036252607, %v2679_v15  ;;  %v1141_v15 = vadd.f32 %v1136_v13, %v2897_v23  ;;  %v3075_v23 = vadd.f32 %v1176_v54, %v2933_v53 }
  0xc4   : > { %1104 = vrot.lane.b32.xlu0 %v1099_v60, %s2359_s7  ;;  %v3082_v60 = vmul.f32 0.00024459098, %v3054_v58  ;;  %v3094_v53 = vmul.f32 -0.0008614724, %v3014_v26  ;;  %v3129_v13 = vmul.f32 -0.0025134145, %v3014_v26 }
  0xc5   : > { %v1140_v37 = vadd.f32 %v1135_v40, %v1130_v25  ;;  %v3034_v33 = vadd.f32 %v1137_v24, %v2894_v8  ;;  %v1177_v8 = vadd.f32 %v1172_v6, %v2909_v43  ;;  %3926 = vst [vmem:[#allocation14_spill] sm:$0xff] %v3075_v23  ;;  %v3078_v43 = vmul.f32 0.0026412997, %v3044_v30 }
  0xc6   : > { %v3116_v25 = vmul.f32 -0.0025134145, %v3054_v58  ;;  %v1560_v40 = vmul.f32 -0.046781015, %v3051_v38  ;;  %v3126_v24 = vmul.f32 0.0016903405, %v3054_v58 }
  0xc7   : > { %1110 = vrot.lane.b32.xlu1 %v1102_v3, %s2359_s7  ;;  %3923 = vst [vmem:[#allocation13_spill] sm:$0xff] %v3034_v33  ;;  %v3097_v3 = vadd.f32 %v1278_v56, %v1273_v49  ;;  %v1559_v6 = vmul.f32 -0.046781015, %v3011_v5  ;;  %v1571_v56 = vmul.f32 0.025451893, %v3044_v30 }
  0xc8   : > { %1108 = vrot.lane.b32.xlu0 %v1101_v51, %s2359_s7  ;;  %v3105_v51 = vmul.f32 0.0016903405, %v3014_v26  ;;  %v1565_v17 = vadd.f32 %v1560_v40, %v3116_v25  ;;  %v1607_v40 = vmul.f32 -0.01086167, %v3030_v7 }
  0xc9   : > { %v1564_v54 = vadd.f32 %v1559_v6, %v3129_v13  ;;  %v1599_v6 = vmul.f32 0.021374006, %v3038_v32 }
  0xcb   : > { %1143 = vrot.lane.b32.xlu1 %v1138_v9, %s2360_s17  ;;  %v3113_v9 = vld [vmem:[%s668_s22 + $0x10] sm:$0xff] }
  0xcc   : > { %1112 = vrot.lane.b32.xlu0 %v3007_v63, %s2359_s7  ;;  %v1572_v62 = vmul.f32 0.025451893, %v3113_v9  ;;  %v1648_v2 = vmul.f32 0.0036252607, %v3113_v9 }
  0xcf   : > { %1147 = vrot.lane.b32.xlu1 %v1140_v37, %s2360_s17  ;;  %v3123_v37 = vadd.f32 %v3082_v60, %v1264_v31  ;;  %v1566_v31 = vadd.f32 %v1561_v48, %v3140_v28  ;;  %v1608_v48 = vmul.f32 -0.01086167, %v3063_v34 }
  0xd0   : > { %1145 = vrot.lane.b32.xlu0 %v2903_v20, %s2360_s17  ;;  %v3070_v20 = vld [vmem:[%s668_s22 + $0x8] sm:$0xff] }
  0xd1   : > { %v3102_v16 = vmul.f32 -0.0008614724, %v3070_v20  ;;  %v3133_v61 = vmul.f32 -0.0025134145, %v3070_v20 }
  0xd3   : > { %1151 = vrot.lane.b32.xlu1 %v3034_v33, %s2360_s17 }
  0xd4   : > { %1149 = vrot.lane.b32.xlu0 %v1141_v15, %s2360_s17  ;;  %v3145_v15 = vadd.f32 %v1570_v21, %v1565_v17  ;;  %v1602_v21 = vadd.f32 %v1597_v52, %v3105_v51  ;;  %v1609_v17 = vmul.f32 -0.01086167, %v3044_v30  ;;  %v1610_v52 = vmul.f32 -0.01086167, %v3113_v9 }
  0xd6   : > { %v3169_v33 = vadd.f32 %v1607_v40, %v1602_v21  ;;  %v3182_v40 = vmul.f32 -0.0008614724, %v3041_v39 }
  0xd7   : > { %1184 = vrot.lane.b32.xlu1 %v2914_v36, %s2361_s23  ;;  %v1562_v36 = vmul.f32 -0.046781015, %v3099_v0 }
  0xd8   : > { %1182 = vrot.lane.b32.xlu0 %v1177_v8, %s2361_s23  ;;  %v3151_v8 = vadd.f32 %v1569_v35, %v1564_v54  ;;  %v3165_v35 = vadd.f32 %v1571_v56, %v1566_v31  ;;  %v1604_v54 = vadd.f32 %v1599_v6, %v3108_v10  ;;  %v1636_v56 = vmul.f32 -0.008977466, %v3051_v38 }
  0xd9   : > { %v1567_v49 = vadd.f32 %v1562_v36, %v3133_v61  ;;  %v1598_v36 = vmul.f32 0.021374006, %v3051_v38  ;;  %v1646_v31 = vmul.f32 0.0036252607, %v3063_v34  ;;  %v1635_v6 = vmul.f32 -0.008977466, %v3011_v5 }
  0xdb   : > { %1188 = vrot.lane.b32.xlu1 %v1180_v1, %s2361_s23  ;;  %v3156_v59 = vadd.f32 %v1572_v62, %v1567_v49  ;;  %v3163_v1 = vmul.f32 0.0016903405, %v3070_v20  ;;  %v1603_v62 = vadd.f32 %v1598_v36, %v3126_v24  ;;  %v1600_v49 = vmul.f32 0.021374006, %v3099_v0 }
  0xdc   : > { %1186 = vrot.lane.b32.xlu0 %v1179_v46, %s2361_s23  ;;  %v3176_v46 = vadd.f32 %v1609_v17, %v1604_v54  ;;  %v1640_v17 = vadd.f32 %v1635_v6, %v3094_v53  ;;  %v1638_v54 = vmul.f32 -0.008977466, %v3099_v0 }
  0xdd   : > { %v3184_v21 = vadd.f32 %v1608_v48, %v1603_v62  ;;  %v1605_v36 = vadd.f32 %v1600_v49, %v3163_v1  ;;  %v1637_v48 = vmul.f32 -0.008977466, %v3038_v32  ;;  %v1647_v62 = vmul.f32 0.0036252607, %v3044_v30 }
  0xde   : > { %3927 = vst [vmem:[#allocation15_spill] sm:$0xff] %v3176_v46  ;;  %v1673_v49 = vmul.f32 0.0026412997, %v3011_v5  ;;  %v1643_v6 = vadd.f32 %v1638_v54, %v3102_v16  ;;  %v1685_v46 = vmul.f32 -0.0005382237, %v3044_v30 }
  0xdf   : > { %1211 = vrot.lane.b32.xlu1 %v2930_v44, %s2362_s24  ;;  %3928 = vst [vmem:[#allocation16_spill] sm:$0xff] %v3184_v21  ;;  %v1641_v44 = vadd.f32 %v1636_v56, %v3091_v55  ;;  %v3194_v50 = vadd.f32 %v1610_v52, %v1605_v36  ;;  %v3203_v56 = vadd.f32 %v1645_v11, %v1640_v17  ;;  %v1683_v21 = vmul.f32 -0.0005382237, %v3030_v7 }
  0xe0   : > { %1190 = vrot.lane.b32.xlu0 %v3075_v23, %s2361_s23  ;;  %v1642_v52 = vadd.f32 %v1637_v48, %v3182_v40  ;;  %v1678_v36 = vadd.f32 %v1673_v49, %v3024_v22  ;;  %v1271_v11 = vmul.f32 0.00024459098, %v3070_v20  ;;  %v1684_v17 = vmul.f32 -0.0005382237, %v3063_v34 }
  0xe1   : > { %3929 = vst [vmem:[#allocation17_spill] sm:$0xff] %v3194_v50  ;;  %v3201_v23 = vadd.f32 %v1646_v31, %v1641_v44  ;;  %3930 = vst [vmem:[#allocation18_spill] sm:$0xff] %v3203_v56  ;;  %v1675_v50 = vmul.f32 0.0026412997, %v3038_v32  ;;  %v3216_v31 = vadd.f32 %v1648_v2, %v1643_v6  ;;  %v1674_v44 = vmul.f32 0.0026412997, %v3051_v38 }
  0xe2   : > { %v3220_v54 = vadd.f32 %v1647_v62, %v1642_v52  ;;  %v3222_v22 = vadd.f32 %v1683_v21, %v1678_v36  ;;  %v1676_v49 = vmul.f32 0.0026412997, %v3099_v0  ;;  %v1251_v6 = vmul.f32 -8.1753797e-07, %v3054_v58 }
  0xe3   : > { %1215 = vrot.lane.b32.xlu1 %v3085_v27, %s2362_s24  ;;  %3931 = vst [vmem:[#allocation19_spill] sm:$0xff] %v3216_v31  ;;  %v1680_v48 = vadd.f32 %v1675_v50, %v3068_v45  ;;  %v1679_v2 = vadd.f32 %v1674_v44, %v3082_v60  ;;  %v1712_v62 = vmul.f32 -0.00018301749, %v3051_v38  ;;  %v1250_v50 = vmul.f32 -8.1753797e-07, %v3014_v26 }
  0xe4   : > { %1213 = vrot.lane.b32.xlu0 %v2950_v19, %s2362_s24  ;;  %3932 = vst [vmem:[#allocation20_spill] sm:$0xff] %v3220_v54  ;;  %3933 = vst [vmem:[#allocation21_spill] sm:$0xff] %v3222_v22  ;;  %v1686_v19 = vmul.f32 -0.0005382237, %v3113_v9  ;;  %v1681_v21 = vadd.f32 %v1676_v49, %v1271_v11  ;;  %v1711_v45 = vmul.f32 -0.00018301749, %v3011_v5 }
  0xe5   : > { %v3213_v27 = vpop.permute.xlu1 %769  ;;  %v3234_v52 = vadd.f32 %v1685_v46, %v1680_v48  ;;  %v1266_v60 = vmul.f32 -0.0005382237, %v3099_v0  ;;  %v3243_v44 = vadd.f32 %v1684_v17, %v1679_v2  ;;  %v1253_v22 = vmul.f32 -8.1753797e-07, %v3070_v20 }
  0xe6   : > { %v3226_v56 = vpop.permute.xlu0 %765  ;;  %v3248_v46 = vadd.f32 %v1686_v19, %v1681_v21  ;;  %v3250_v48 = vadd.f32 %v1711_v45, %v1250_v50  ;;  %v1714_v49 = vmul.f32 -0.00018301749, %v3099_v0  ;;  %v1307_v17 = vmul.f32 0.0036252607, %v3051_v38 }
  0xe7   : > { %1219 = vrot.lane.b32.xlu1 %v2953_v4, %s2362_s24  ;;  %3934 = vst [vmem:[#allocation22_spill] sm:$0xff] %v3234_v52  ;;  %3935 = vst [vmem:[#allocation23_spill] sm:$0xff] %v3243_v44  ;;  %v3245_v4 = vadd.f32 %v1712_v62, %v1251_v6  ;;  %v1252_v2 = vmul.f32 -8.1753797e-07, %v3041_v39  ;;  %v1713_v62 = vmul.f32 -0.00018301749, %v3038_v32  ;;  %v1284_v19 = vadd.f32 %v3088_v57, %v3123_v37 }
  0xe8   : > { %1217 = vrot.lane.b32.xlu0 %v2956_v14, %s2362_s24  ;;  %3937 = vst [vmem:[#allocation25_spill] sm:$0xff] %v3248_v46  ;;  %3938 = vst [vmem:[#allocation26_spill] sm:$0xff] %v3250_v48  ;;  %v1285_v14 = vadd.f32 %v3078_v43, %v3111_v41  ;;  %v1281_v21 = vmul.f32 0.0026412997, %v3113_v9  ;;  %v3265_v45 = vadd.f32 %v1714_v49, %v1253_v22  ;;  %v1255_v48 = vmul.f32 -0.00018301749, %v3030_v7 }
  0xe9   : > { %v3240_v36 = vpop.permute.xlu1 %771  ;;  %3936 = vst [vmem:[#allocation24_spill] sm:$0xff] %v3245_v4  ;;  %v1276_v43 = vadd.f32 %v1271_v11, %v1266_v60  ;;  %v1306_v41 = vmul.f32 0.0036252607, %v3011_v5  ;;  %v3273_v46 = vadd.f32 %v1713_v62, %v1252_v2  ;;  %v1256_v44 = vmul.f32 -0.00018301749, %v3063_v34 }
  0xea   : > { %v3253_v52 = vpop.permute.xlu0 %767  ;;  %3939 = vst [vmem:[#allocation27_spill] sm:$0xff] %v3265_v45  ;;  %v3276_v54 = vadd.f32 %v1255_v48, %v1250_v50  ;;  %v1257_v57 = vmul.f32 -0.00018301749, %v3044_v30  ;;  %v1317_v22 = vadd.f32 %v3091_v55, %v1307_v17  ;;  %v1322_v49 = vmul.f32 -0.008977466, %v3063_v34  ;;  %v3945_v17 = vld [vmem:[#allocation6_spill] sm:$0xff] }
  0xeb   : > { %1289 = vrot.lane.b32.xlu1 %v3097_v3, %s2351_s11  ;;  %v3940_v3 = vld [vmem:[#allocation5_spill] sm:$0xff]  ;;  %v1309_v11 = vmul.f32 0.0036252607, %v3099_v0  ;;  %v3285_v60 = vadd.f32 %v1256_v44, %v1251_v6  ;;  %v1286_v48 = vadd.f32 %v1281_v21, %v1276_v43  ;;  %v3394_v45 = vmul.f32 0.0031138735, %v3070_v20 }
  0xec   : > { %1287 = vrot.lane.b32.xlu0 %v3940_v3, %s2351_s11  ;;  %3941 = vst [vmem:[#allocation5_spill] sm:$0xff] %v3273_v46  ;;  %3942 = vst [vmem:[#allocation28_spill] sm:$0xff] %v3276_v54  ;;  %v3287_v62 = vadd.f32 %v1257_v57, %v1252_v2  ;;  %v1316_v3 = vadd.f32 %v3094_v53, %v1306_v41  ;;  %v1321_v54 = vmul.f32 -0.008977466, %v3030_v7  ;;  %v1324_v2 = vmul.f32 -0.008977466, %v3113_v9 }
  0xed   : > { %v3270_v4 = vpop.permute.xlu1 %811  ;;  %3943 = vst [vmem:[#allocation29_spill] sm:$0xff] %v3285_v60  ;;  %v1327_v6 = vadd.f32 %v1322_v49, %v1317_v22  ;;  %v1319_v44 = vadd.f32 %v3102_v16, %v1309_v11  ;;  %v1323_v41 = vmul.f32 -0.008977466, %v3044_v30  ;;  %v1364_v49 = vmul.f32 0.021374006, %v3030_v7 }
  0xee   : > { %v3279_v37 = vpop.permute.xlu0 %773  ;;  %3944 = vst [vmem:[#allocation30_spill] sm:$0xff] %v3287_v62  ;;  %v1326_v53 = vadd.f32 %v1321_v54, %v1316_v3  ;;  %v1351_v11 = vmul.f32 -0.01086167, %v3038_v32  ;;  %v1409_v60 = vmul.f32 -0.046781015, %v3044_v30 }
  0xef   : > { %1293 = vrot.lane.b32.xlu1 %v1285_v14, %s2351_s11  ;;  %v1308_v14 = vmul.f32 0.0036252607, %v3038_v32  ;;  %v1329_v22 = vadd.f32 %v1324_v2, %v1319_v44  ;;  %v1365_v2 = vmul.f32 0.021374006, %v3063_v34  ;;  %v1450_v46 = vmul.f32 0.1353459, %v3030_v7 }
  0xf0   : > { %1291 = vrot.lane.b32.xlu0 %v1284_v19, %s2351_s11  ;;  %v1349_v19 = vmul.f32 -0.01086167, %v3011_v5 }
  0xf1   : > { %v3290_v50 = vpop.permute.xlu1 %815  ;;  %v1318_v43 = vadd.f32 %v3182_v40, %v1308_v14  ;;  %v1350_v40 = vmul.f32 -0.01086167, %v3051_v38 }
  0xf2   : > { %v3295_v55 = vpop.permute.xlu0 %813  ;;  %v1359_v16 = vadd.f32 %v3105_v51, %v1349_v19  ;;  %v1366_v51 = vmul.f32 0.021374006, %v3044_v30  ;;  %v1352_v19 = vmul.f32 -0.01086167, %v3099_v0 }
  0xf3   : > { %1330 = vrot.lane.b32.xlu1 %v3945_v17, %s2352_s4  ;;  %v1328_v54 = vadd.f32 %v1323_v41, %v1318_v43  ;;  %v1361_v17 = vadd.f32 %v3108_v10, %v1351_v11  ;;  %v1360_v44 = vadd.f32 %v3126_v24, %v1350_v40  ;;  %v1393_v41 = vmul.f32 0.025451893, %v3051_v38  ;;  %v3946_v10 = vld [vmem:[#allocation7_spill] sm:$0xff] }
  0xf4   : > { %1295 = vrot.lane.b32.xlu0 %v1286_v48, %s2351_s11  ;;  %v1369_v14 = vadd.f32 %v1364_v49, %v1359_v16  ;;  %v1362_v49 = vadd.f32 %v3163_v1, %v1352_v19  ;;  %v1367_v24 = vmul.f32 0.021374006, %v3113_v9  ;;  %v1392_v11 = vmul.f32 0.025451893, %v3011_v5  ;;  %s3741_s11 = scalar_lea.vmem %s3892_s2, %s1970_s13 }
  0xf5   : > { %v3303_v21 = vpop.permute.xlu1 %819  ;;  %v1371_v43 = vadd.f32 %v1366_v51, %v1361_v17  ;;  %v1370_v16 = vadd.f32 %v1365_v2, %v1360_v44  ;;  %v1403_v40 = vadd.f32 %v3116_v25, %v1393_v41  ;;  %v1395_v17 = vmul.f32 0.025451893, %v3099_v0  ;;  %v3947_v25 = vld [vmem:[#allocation8_spill] sm:$0xff] }
  0xf6   : > { %v3307_v57 = vpop.permute.xlu0 %817  ;;  %v1372_v44 = vadd.f32 %v1367_v24, %v1362_v49  ;;  %v1402_v1 = vadd.f32 %v3129_v13, %v1392_v11  ;;  %v1407_v2 = vmul.f32 -0.046781015, %v3030_v7  ;;  %v1394_v19 = vmul.f32 0.025451893, %v3038_v32 }
  0xf7   : > { %1334 = vrot.lane.b32.xlu1 %v1327_v6, %s2352_s4  ;;  %v1405_v62 = vadd.f32 %v3133_v61, %v1395_v17  ;;  %v3359_v49 = vmul.f32 0.0031138735, %v3014_v26  ;;  %v3373_v17 = vmul.f32 0.0031138735, %v3041_v39 }
  0xf8   : > { %1332 = vrot.lane.b32.xlu0 %v1326_v53, %s2352_s4  ;;  %v1412_v24 = vadd.f32 %v1407_v2, %v1402_v1  ;;  %v1404_v11 = vadd.f32 %v3140_v28, %v1394_v19  ;;  %v1436_v1 = vmul.f32 -0.059479933, %v3051_v38  ;;  %v3380_v2 = vmul.f32 0.0031138735, %v3054_v58 }
  0xf9   : > { %v3314_v48 = vpop.permute.xlu1 %857 }
  0xfa   : > { %v3317_v3 = vpop.permute.xlu0 %855  ;;  %v1414_v28 = vadd.f32 %v1409_v60, %v1404_v11  ;;  %v1446_v60 = vadd.f32 %v3380_v2, %v1436_v1  ;;  %v1438_v11 = vmul.f32 -0.059479933, %v3099_v0 }
  0xfb   : > { %1338 = vrot.lane.b32.xlu1 %v1329_v22, %s2352_s4 }
  0xfc   : > { %1336 = vrot.lane.b32.xlu0 %v1328_v54, %s2352_s4 }
  0xfd   : > { %v3323_v6 = vpop.permute.xlu1 %861 }
  0xfe   : > { %v3328_v53 = vpop.permute.xlu0 %859 }
  0xff   : > { %1375 = vrot.lane.b32.xlu1 %v1369_v14, %s2353_s5  ;;  %v1408_v14 = vmul.f32 -0.046781015, %v3063_v34 }
 0x100   : > { %1373 = vrot.lane.b32.xlu0 %v3946_v10, %s2353_s5  ;;  %v1410_v10 = vmul.f32 -0.046781015, %v3113_v9 }
 0x101   : > { %v3334_v22 = vpop.permute.xlu1 %899  ;;  %v1413_v41 = vadd.f32 %v1408_v14, %v1403_v40  ;;  %v1437_v14 = vmul.f32 -0.059479933, %v3038_v32 }
 0x102   : > { %v3339_v54 = vpop.permute.xlu0 %863  ;;  %v1415_v61 = vadd.f32 %v1410_v10, %v1405_v62 }
 0x103   : > { %1379 = vrot.lane.b32.xlu1 %v1371_v43, %s2353_s5  ;;  %v1447_v10 = vadd.f32 %v3373_v17, %v1437_v14  ;;  %v1453_v14 = vmul.f32 0.1353459, %v3113_v9 }
 0x104   : > { %1377 = vrot.lane.b32.xlu0 %v1370_v16, %s2353_s5  ;;  %v1435_v16 = vmul.f32 -0.059479933, %v3011_v5 }
 0x105   : > { %v3346_v51 = vpop.permute.xlu1 %903 }
 0x106   : > { %v3352_v43 = vpop.permute.xlu0 %901  ;;  %v1445_v40 = vadd.f32 %v3359_v49, %v1435_v16 }
 0x107   : > { %1416 = vrot.lane.b32.xlu1 %v3947_v25, %s2354_s21 }
 0x108   : > { %1381 = vrot.lane.b32.xlu0 %v1372_v44, %s2353_s5  ;;  %v1455_v62 = vadd.f32 %v1450_v46, %v1445_v40  ;;  %v1484_v40 = vmul.f32 0.33, %v3054_v58  ;;  %v1494_v58 = vmul.f32 0.2719428, %v3063_v34 }
 0x109   : > { %v3362_v13 = vpop.permute.xlu1 %907 }
 0x10a   : > { %3948 = vst [vmem:[#allocation6_spill] sm:$0xff] %v3362_v13  ;;  %v3367_v25 = vpop.permute.xlu0 %905  ;;  %v1483_v13 = vmul.f32 0.33, %v3014_v26  ;;  %v1480_v26 = vmul.f32 0.2719428, %v3038_v32 }
 0x10b   : > { %3949 = vst [vmem:[#allocation7_spill] sm:$0xff] %v3367_v25  ;;  %1420 = vrot.lane.b32.xlu1 %v1413_v41, %s2354_s21  ;;  %v1452_v41 = vmul.f32 0.1353459, %v3044_v30  ;;  %v1478_v25 = vmul.f32 0.2719428, %v3011_v5 }
 0x10c   : > { %1418 = vrot.lane.b32.xlu0 %v1412_v24, %s2354_s21  ;;  %v1451_v24 = vmul.f32 0.1353459, %v3063_v34 }
 0x10d   : > { %v3376_v44 = vpop.permute.xlu1 %945  ;;  %v1457_v46 = vadd.f32 %v1452_v41, %v1447_v10  ;;  %v1481_v41 = vmul.f32 0.2719428, %v3099_v0 }
 0x10e   : > { %v3382_v19 = vpop.permute.xlu0 %943  ;;  %v1456_v1 = vadd.f32 %v1451_v24, %v1446_v60 }
 0x10f   : > { %1424 = vrot.lane.b32.xlu1 %v1415_v61, %s2354_s21  ;;  %v1479_v61 = vmul.f32 0.2719428, %v3051_v38 }
 0x110   : > { %1422 = vrot.lane.b32.xlu0 %v1414_v28, %s2354_s21 }
 0x111   : > { %v3388_v16 = vpop.permute.xlu1 %949  ;;  %v1489_v10 = vadd.f32 %v1484_v40, %v1479_v61 }
 0x112   : > { %3950 = vst [vmem:[#allocation8_spill] sm:$0xff] %v3388_v16  ;;  %v3396_v31 = vpop.permute.xlu0 %947  ;;  %v1448_v16 = vadd.f32 %v3394_v45, %v1438_v11  ;;  %v1488_v11 = vadd.f32 %v1483_v13, %v1478_v25 }
 0x113   : > { %3951 = vst [vmem:[#allocation31_spill] sm:$0xff] %v3396_v31  ;;  %1461 = vrot.lane.b32.xlu1 %v1455_v62, %s2355_s18  ;;  %v1499_v61 = vadd.f32 %v1494_v58, %v1489_v10  ;;  %v1521_v31 = vmul.f32 0.1353459, %v3011_v5  ;;  %v1531_v10 = vmul.f32 -0.059479933, %v3030_v7 }
 0x114   : > { %1459 = vrot.lane.b32.xlu0 %v2863_v18, %s2355_s18  ;;  %v1486_v18 = vmul.f32 0.33, %v3070_v20  ;;  %v1458_v24 = vadd.f32 %v1453_v14, %v1448_v16  ;;  %v1496_v20 = vmul.f32 0.2719428, %v3113_v9  ;;  %v1495_v16 = vmul.f32 0.2719428, %v3044_v30 }
 0x115   : > { %v3404_v28 = vpop.permute.xlu1 %987  ;;  %v1523_v58 = vmul.f32 0.1353459, %v3038_v32 }
 0x116   : > { %3952 = vst [vmem:[#allocation32_spill] sm:$0xff] %v3404_v28  ;;  %v3409_v62 = vpop.permute.xlu0 %951  ;;  %v1493_v28 = vmul.f32 0.2719428, %v3030_v7  ;;  %v1491_v40 = vadd.f32 %v1486_v18, %v1481_v41 }
 0x117   : > { %3953 = vst [vmem:[#allocation33_spill] sm:$0xff] %v3409_v62  ;;  %1465 = vrot.lane.b32.xlu1 %v1457_v46, %s2355_s18  ;;  %v1485_v62 = vmul.f32 0.33, %v3041_v39 }
 0x118   : > { %1463 = vrot.lane.b32.xlu0 %v1456_v1, %s2355_s18  ;;  %v1498_v13 = vadd.f32 %v1493_v28, %v1488_v11  ;;  %v1501_v14 = vadd.f32 %v1496_v20, %v1491_v40  ;;  %v1522_v28 = vmul.f32 0.1353459, %v3051_v38  ;;  %v1524_v11 = vmul.f32 0.1353459, %v3099_v0 }
 0x119   : > { %v3417_v60 = vpop.permute.xlu1 %991  ;;  %v1490_v25 = vadd.f32 %v1485_v62, %v1480_v26  ;;  %v1534_v40 = vmul.f32 -0.059479933, %v3113_v9 }
 0x11a   : > { %v3421_v46 = vpop.permute.xlu0 %989  ;;  %v1527_v32 = vadd.f32 %v1522_v28, %v3380_v2 }
 0x11b   : > { %1502 = vrot.lane.b32.xlu1 %v2875_v42, %s2356_s19  ;;  %v1526_v42 = vadd.f32 %v1521_v31, %v3359_v49  ;;  %v1500_v41 = vadd.f32 %v1495_v16, %v1490_v25  ;;  %v1533_v31 = vmul.f32 -0.059479933, %v3044_v30  ;;  %v1532_v49 = vmul.f32 -0.059479933, %v3063_v34 }
 0x11c   : > { %1467 = vrot.lane.b32.xlu0 %v1458_v24, %s2355_s18  ;;  %v1528_v24 = vadd.f32 %v1523_v58, %v3373_v17  ;;  %v2193_v58 = vld [vmem:[%s2608_s3 + $0x98] sm:$0xff] }
 0x11d   : > { %v3428_v1 = vpop.permute.xlu1 %995  ;;  %v1536_v18 = vadd.f32 %v1531_v10, %v1526_v42  ;;  %v1537_v30 = vadd.f32 %v1532_v49, %v1527_v32  ;;  %v3957_v49 = vld [vmem:[#allocation16_spill] sm:$0xff] }
 0x11e   : > { %v3431_v39 = vpop.permute.xlu0 %993  ;;  %v1538_v26 = vadd.f32 %v1533_v31, %v1528_v24  ;;  %v3955_v24 = vld [vmem:[#allocation4_spill] sm:$0xff] }
 0x11f   : > { %1506 = vrot.lane.b32.xlu1 %v1499_v61, %s2356_s19  ;;  %v1529_v61 = vadd.f32 %v1524_v11, %v3394_v45  ;;  %v775_v45 = vlaneseq }
 0x120   : > { %1504 = vrot.lane.b32.xlu0 %v1498_v13, %s2356_s19 }
 0x121   : > { %v3438_v5 = vpop.permute.xlu1 %1028  ;;  %v1539_v0 = vadd.f32 %v1534_v40, %v1529_v61 }
 0x122   : > { %v3441_v62 = vpop.permute.xlu0 %1026 }
 0x123   : > { %1510 = vrot.lane.b32.xlu1 %v1501_v14, %s2356_s19 }
 0x124   : > { %1508 = vrot.lane.b32.xlu0 %v1500_v41, %s2356_s19 }
 0x125   : > { %v3447_v7 = vpop.permute.xlu1 %1032 }
 0x126   : > { %v3452_v38 = vpop.permute.xlu0 %1030 }
 0x127   : > { %1542 = vrot.lane.b32.xlu1 %v1536_v18, %s2357_s20  ;;  %v3954_v18 = vld [vmem:[#allocation15_spill] sm:$0xff] }
 0x128   : > { %1540 = vrot.lane.b32.xlu0 %v2966_v29, %s2357_s20 }
 0x129   : > { %v3457_v17 = vpop.permute.xlu1 %1065 }
 0x12a   : > { %v3461_v2 = vpop.permute.xlu0 %1034 }
 0x12b   : > { %1546 = vrot.lane.b32.xlu1 %v1538_v26, %s2357_s20 }
 0x12c   : > { %1544 = vrot.lane.b32.xlu0 %v1537_v30, %s2357_s20  ;;  %v3958_v30 = vld [vmem:[#allocation12_spill] sm:$0xff] }
 0x12d   : > { %v3465_v34 = vpop.permute.xlu1 %1069 }
 0x12e   : > { %v3467_v20 = vpop.permute.xlu0 %1067 }
 0x12f   : > { %1578 = vrot.lane.b32.xlu1 %v2978_v47, %s2358_s6  ;;  %v3486_v47 = vand.u32 127, %v775_v45 }
 0x130   : > { %1548 = vrot.lane.b32.xlu0 %v1539_v0, %s2357_s20  ;;  %v3959_v0 = vld [vmem:[#allocation13_spill] sm:$0xff] }
 0x131   : > { %v3472_v29 = vpop.permute.xlu1 %1073  ;;  %vm777_vm0 = vcmp.lt.s32.totalorder %v3486_v47, 127  ;;  %vm821_vm1 = vcmp.lt.s32.totalorder %v3486_v47, 126  ;;  %vm865_vm2 = vcmp.lt.s32.totalorder %v3486_v47, 125  ;;  %vm909_vm3 = vcmp.lt.s32.totalorder %v3486_v47, 124 }
 0x132   : > { %v3474_v9 = vpop.permute.xlu0 %1071  ;;  %v824_v26 = vsel %vm821_vm1, %v3295_v55, %v3290_v50  ;;  %vm953_vm4 = vcmp.lt.s32.totalorder %v3486_v47, 123  ;;  %vm997_vm5 = vcmp.lt.s32.totalorder %v3486_v47, 122  ;;  %vm1036_vm6 = vcmp.lt.s32.totalorder %v3486_v47, 121 }
 0x133   : > { %1582 = vrot.lane.b32.xlu1 %v3145_v15, %s2358_s6  ;;  %v2191_v15 = vld [vmem:[%s2608_s3 + $0x80] sm:$0xff]  ;;  %v869_v45 = vsel %vm865_vm2, %v3317_v3, %v3314_v48  ;;  %vm1075_vm7 = vcmp.lt.s32.totalorder %v3486_v47, 120  ;;  %vm1114_vm8 = vcmp.lt.s32.totalorder %v3486_v47, 119  ;;  %v912_v3 = vsel %vm909_vm3, %v3352_v43, %v3346_v51 }
 0x134   : > { %1580 = vrot.lane.b32.xlu0 %v3151_v8, %s2358_s6  ;;  %v732_v14 = vmul.f32 -0.00018301749, %v2191_v15  ;;  %v2192_v8 = vld [vmem:[%s2608_s3 + $0x90] sm:$0xff]  ;;  %v868_v15 = vsel %vm865_vm2, %v3314_v48, %v3328_v53  ;;  %v823_v48 = vsel %vm821_vm1, %v3290_v50, %v3307_v57  ;;  %vm1153_vm9 = vcmp.lt.s32.totalorder %v3486_v47, 118 }
 0x135   : > { %v3480_v13 = vpop.permute.xlu1 %1106  ;;  %v734_v10 = vmul.f32 -0.00018301749, %v2192_v8  ;;  %v867_v50 = vsel %vm865_vm2, %v3328_v53, %v3323_v6  ;;  %v3962_v53 = vld [vmem:[#allocation18_spill] sm:$0xff]  ;;  %vm1192_vm10 = vcmp.lt.s32.totalorder %v3486_v47, 117  ;;  %vm1221_vm11 = vcmp.lt.s32.totalorder %v3486_v47, 116 }
 0x136   : > { %v3482_v25 = vpop.permute.xlu0 %1104 }
 0x137   : > { %1586 = vrot.lane.b32.xlu1 %v3156_v59, %s2358_s6  ;;  %v735_v59 = vmul.f32 -0.00018301749, %v2193_v58  ;;  %v738_v31 = vadd.f32 %v734_v10, %v3955_v24  ;;  %v913_v10 = vsel %vm909_vm3, %v3334_v22, %v3352_v43  ;;  %v957_v22 = vsel %vm953_vm4, %v3382_v19, %v3376_v44  ;;  %v3961_v43 = vld [vmem:[#allocation31_spill] sm:$0xff] }
 0x138   : > { %1584 = vrot.lane.b32.xlu0 %v3165_v35, %s2358_s6  ;;  %v736_v35 = vadd.f32 %v732_v14, %v2920_v12  ;;  %v3956_v12 = vld [vmem:[#allocation10_spill] sm:$0xff] }
 0x139   : > { %v3490_v16 = vpop.permute.xlu1 %1110  ;;  %v739_v32 = vadd.f32 %v735_v59, %v3956_v12 }
 0x13a   : > { %v3493_v42 = vpop.permute.xlu0 %1108 }
 0x13b   : > { %1618 = vrot.lane.b32.xlu1 %v3169_v33, %s2359_s7  ;;  %v780_v33 = vsel %vm777_vm0, %v3253_v52, %v3213_v27 }
 0x13c   : > { %1616 = vrot.lane.b32.xlu0 %v3007_v63, %s2359_s7  ;;  %v781_v63 = vsel %vm777_vm0, %v3226_v56, %v3253_v52  ;;  %v825_v56 = vsel %vm821_vm1, %v3270_v4, %v3295_v55  ;;  %v783_v61 = vadd.f32 %v780_v33, %v3958_v30  ;;  %v779_v4 = vsel %vm777_vm0, %v3213_v27, %v3240_v36  ;;  %v3960_v27 = vld [vmem:[#allocation17_spill] sm:$0xff] }
 0x13d   : > { %v3502_v41 = vpop.permute.xlu1 %1143  ;;  %v782_v52 = vadd.f32 %v781_v63, %v736_v35  ;;  %v778_v55 = vsel %vm777_vm0, %v3240_v36, %v3279_v37  ;;  %v822_v37 = vsel %vm821_vm1, %v3307_v57, %v3303_v21  ;;  %v784_v58 = vadd.f32 %v779_v4, %v738_v31  ;;  %v3966_v4 = vld [vmem:[#allocation19_spill] sm:$0xff] }
 0x13e   : > { %v3506_v28 = vpop.permute.xlu0 %1112  ;;  %v827_v8 = vadd.f32 %v824_v26, %v783_v61  ;;  %v785_v59 = vadd.f32 %v778_v55, %v739_v32  ;;  %v866_v57 = vsel %vm865_vm2, %v3323_v6, %v3339_v54  ;;  %v3963_v6 = vld [vmem:[#allocation6_spill] sm:$0xff]  ;;  %v3964_v54 = vld [vmem:[#allocation7_spill] sm:$0xff]  ;;  %v1000_v32 = vsel %vm997_vm5, %v3421_v46, %v3417_v60 }
 0x13f   : > { %1622 = vrot.lane.b32.xlu1 %v3954_v18, %s2359_s7  ;;  %v826_v14 = vadd.f32 %v825_v56, %v782_v52  ;;  %v828_v33 = vadd.f32 %v823_v48, %v784_v58  ;;  %v910_v19 = vsel %vm909_vm3, %v3964_v54, %v3963_v6  ;;  %v1078_v58 = vsel %vm1075_vm7, %v3467_v20, %v3465_v34 }
 0x140   : > { %1620 = vrot.lane.b32.xlu0 %v3957_v49, %s2359_s7  ;;  %v871_v18 = vadd.f32 %v868_v15, %v827_v8  ;;  %v829_v63 = vadd.f32 %v822_v37, %v785_v59  ;;  %v3965_v49 = vld [vmem:[#allocation32_spill] sm:$0xff]  ;;  %v1040_v15 = vsel %vm1036_vm6, %v3441_v62, %v3438_v5  ;;  %v999_v62 = vsel %vm997_vm5, %v3417_v60, %v3431_v39 }
 0x141   : > { %v3523_v11 = vpop.permute.xlu1 %1147  ;;  %v870_v35 = vadd.f32 %v869_v45, %v826_v14  ;;  %v1001_v26 = vsel %vm997_vm5, %v3965_v49, %v3421_v46  ;;  %v872_v56 = vadd.f32 %v867_v50, %v828_v33  ;;  %v3968_v45 = vld [vmem:[#allocation33_spill] sm:$0xff]  ;;  %v1039_v14 = vsel %vm1036_vm6, %v3438_v5, %v3452_v38 }
 0x142   : > { %v3538_v40 = vpop.permute.xlu0 %1145  ;;  %v915_v31 = vadd.f32 %v912_v3, %v871_v18  ;;  %v873_v52 = vadd.f32 %v866_v57, %v829_v63  ;;  %v3969_v3 = vld [vmem:[#allocation20_spill] sm:$0xff]  ;;  %v998_v5 = vsel %vm997_vm5, %v3431_v39, %v3428_v1  ;;  %v1079_v59 = vsel %vm1075_vm7, %v3457_v17, %v3467_v20 }
 0x143   : > { %1654 = vrot.lane.b32.xlu1 %v3959_v0, %s2360_s17  ;;  %v914_v24 = vadd.f32 %v913_v10, %v870_v35  ;;  %v1038_v60 = vsel %vm1036_vm6, %v3452_v38, %v3447_v7  ;;  %v1037_v39 = vsel %vm1036_vm6, %v3447_v7, %v3461_v2  ;;  %v1118_v17 = vsel %vm1114_vm8, %v3482_v25, %v3480_v13  ;;  %v3972_v38 = vld [vmem:[#allocation14_spill] sm:$0xff] }
 0x144   : > { %1624 = vrot.lane.b32.xlu0 %v3960_v27, %s2359_s7  ;;  %v917_v27 = vadd.f32 %v910_v19, %v873_v52  ;;  %v1117_v20 = vsel %vm1114_vm8, %v3480_v13, %v3493_v42  ;;  %v1076_v7 = vsel %vm1075_vm7, %v3474_v9, %v3472_v29  ;;  %v1077_v2 = vsel %vm1075_vm7, %v3465_v34, %v3474_v9  ;;  %v3973_v19 = vld [vmem:[#allocation22_spill] sm:$0xff] }
 0x145   : > { %v3562_v36 = vpop.permute.xlu1 %1151  ;;  %v958_v30 = vadd.f32 %v957_v22, %v914_v24  ;;  %v3971_v22 = vld [vmem:[#allocation21_spill] sm:$0xff]  ;;  %v1156_v13 = vsel %vm1153_vm9, %v3538_v40, %v3523_v11  ;;  %v1157_v25 = vsel %vm1153_vm9, %v3502_v41, %v3538_v40  ;;  %v1116_v34 = vsel %vm1114_vm8, %v3493_v42, %v3490_v16 }
 0x146   : > { %v3581_v21 = vpop.permute.xlu0 %1149  ;;  %v1115_v9 = vsel %vm1114_vm8, %v3490_v16, %v3506_v28  ;;  %v2194_v28 = vld [vmem:[%s2608_s3 + $0xa0] sm:$0xff] }
 0x147   : > { %1658 = vrot.lane.b32.xlu1 %v3201_v23, %s2360_s17  ;;  %v956_v23 = vsel %vm953_vm4, %v3376_v44, %v3961_v43  ;;  %v911_v44 = vsel %vm909_vm3, %v3346_v51, %v3964_v54  ;;  %v3967_v51 = vld [vmem:[#allocation8_spill] sm:$0xff]  ;;  %v1002_v37 = vadd.f32 %v1001_v26, %v958_v30  ;;  %v1154_v16 = vsel %vm1153_vm9, %v3581_v21, %v3562_v36 }
 0x148   : > { %1656 = vrot.lane.b32.xlu0 %v3962_v53, %s2360_s17  ;;  %v959_v61 = vadd.f32 %v956_v23, %v915_v31  ;;  %v955_v55 = vsel %vm953_vm4, %v3961_v43, %v3967_v51  ;;  %v954_v46 = vsel %vm953_vm4, %v3967_v51, %v3968_v45  ;;  %v916_v8 = vadd.f32 %v911_v44, %v872_v56  ;;  %v3974_v56 = vld [vmem:[#allocation23_spill] sm:$0xff] }
 0x149   : > { %v1185_v12 = vpop.permute.xlu1 %1184  ;;  %v961_v18 = vadd.f32 %v954_v46, %v917_v27  ;;  %v1041_v1 = vadd.f32 %v1040_v15, %v1002_v37  ;;  %v1155_v42 = vsel %vm1153_vm9, %v3523_v11, %v3581_v21  ;;  %v3976_v27 = vld [vmem:[#allocation25_spill] sm:$0xff] }
 0x14a   : > { %v1183_v0 = vpop.permute.xlu0 %1182  ;;  %v1003_v48 = vadd.f32 %v1000_v32, %v959_v61  ;;  %v960_v35 = vadd.f32 %v955_v55, %v916_v8  ;;  %v3975_v55 = vld [vmem:[#allocation11_spill] sm:$0xff] }
 0x14b   : > { %1662 = vrot.lane.b32.xlu1 %v3966_v4, %s2360_s17  ;;  %v1005_v23 = vadd.f32 %v998_v5, %v961_v18  ;;  %v1080_v33 = vadd.f32 %v1079_v59, %v1041_v1  ;;  %v1196_v41 = vsel %vm1192_vm10, %v1183_v0, %v1185_v12  ;;  %v3977_v5 = vld [vmem:[#allocation24_spill] sm:$0xff]  ;;  %v3978_v18 = vld [vmem:[#allocation26_spill] sm:$0xff] }
 0x14c   : > { %1660 = vrot.lane.b32.xlu0 %v3969_v3, %s2360_s17  ;;  %v1042_v50 = vadd.f32 %v1039_v14, %v1003_v48  ;;  %v1004_v43 = vadd.f32 %v999_v62, %v960_v35 }
 0x14d   : > { %v1189_v10 = vpop.permute.xlu1 %1188  ;;  %v1044_v53 = vadd.f32 %v1037_v39, %v1005_v23  ;;  %v1119_v6 = vadd.f32 %v1118_v17, %v1080_v33 }
 0x14e   : > { %v1187_v57 = vpop.permute.xlu0 %1186  ;;  %v1081_v63 = vadd.f32 %v1078_v58, %v1042_v50  ;;  %v1043_v31 = vadd.f32 %v1038_v60, %v1004_v43  ;;  %v3979_v50 = vld [vmem:[#allocation9_spill] sm:$0xff]  ;;  %v3980_v60 = vld [vmem:[#allocation27_spill] sm:$0xff] }
 0x14f   : > { %1694 = vrot.lane.b32.xlu1 %v3971_v22, %s2361_s23  ;;  %v1195_v40 = vsel %vm1192_vm10, %v1185_v12, %v1187_v57  ;;  %v1083_v32 = vadd.f32 %v1076_v7, %v1044_v53  ;;  %v1158_v49 = vadd.f32 %v1157_v25, %v1119_v6  ;;  %v1254_v12 = vmul.f32 -0.00018301749, %v2194_v28  ;;  %v3983_v7 = vld [vmem:[#allocation29_spill] sm:$0xff]  ;;  %v3984_v53 = vld [vmem:[#allocation30_spill] sm:$0xff] }
 0x150   : > { %1692 = vrot.lane.b32.xlu0 %v3972_v38, %s2361_s23  ;;  %v1120_v29 = vadd.f32 %v1117_v20, %v1081_v63  ;;  %v1082_v44 = vadd.f32 %v1077_v2, %v1043_v31  ;;  %v1194_v45 = vsel %vm1192_vm10, %v1187_v57, %v1189_v10  ;;  %v3981_v20 = vld [vmem:[#allocation5_spill] sm:$0xff]  ;;  %v3982_v38 = vld [vmem:[#allocation28_spill] sm:$0xff] }
 0x151   : > { %v1212_v24 = vpop.permute.xlu1 %1211  ;;  %v1122_v61 = vadd.f32 %v1115_v9, %v1083_v32  ;;  %v1197_v0 = vadd.f32 %v1196_v41, %v1158_v49  ;;  %v1258_v57 = vadd.f32 %v1254_v12, %v3979_v50 }
 0x152   : > { %v1191_v54 = vpop.permute.xlu0 %1190  ;;  %v1159_v26 = vadd.f32 %v1156_v13, %v1120_v29  ;;  %v1121_v30 = vadd.f32 %v1116_v34, %v1082_v44 }
 0x153   : > { %1698 = vrot.lane.b32.xlu1 %v3973_v19, %s2361_s23  ;;  %v1193_v36 = vsel %vm1192_vm10, %v1189_v10, %v1191_v54  ;;  %v1161_v15 = vadd.f32 %v1154_v16, %v1122_v61 }
 0x154   : > { %1696 = vrot.lane.b32.xlu0 %v3974_v56, %s2361_s23  ;;  %v1198_v4 = vadd.f32 %v1195_v40, %v1159_v26  ;;  %v1160_v46 = vadd.f32 %v1155_v42, %v1121_v30 }
 0x155   : > { %v1216_v52 = vpop.permute.xlu1 %1215  ;;  %v1200_v3 = vadd.f32 %v1193_v36, %v1161_v15 }
 0x156   : > { %v1214_v51 = vpop.permute.xlu0 %1213  ;;  %v1199_v48 = vadd.f32 %v1194_v45, %v1160_v46 }
 0x157   : > { %1720 = vrot.lane.b32.xlu1 %v3975_v55, %s2362_s24  ;;  %v1224_v11 = vsel %vm1221_vm11, %v1214_v51, %v1216_v52  ;;  %v1225_v21 = vsel %vm1221_vm11, %v1212_v24, %v1214_v51 }
 0x158   : > { %v1226_v14 = vadd.f32 %v1225_v21, %v1197_v0  ;;  %v1227_v8 = vadd.f32 %v1224_v11, %v1198_v4  ;;  %1700 = vrot.lane.b32.xlu0 %v3976_v27, %s2361_s23 }
 0x159   : > { %v1220_v37 = vpop.permute.xlu1 %1219 }
 0x15a   : > { %1230 = vst [vmem:[%s3741_s11] sm:$0xff] %v1226_v14  ;;  %1231 = vst [vmem:[%s3741_s11 + $0x8] sm:$0xff] %v1227_v8  ;;  %v1218_v10 = vpop.permute.xlu0 %1217 }
 0x15b   : > { %1724 = vrot.lane.b32.xlu1 %v3977_v5, %s2362_s24  ;;  %v1222_v62 = vsel %vm1221_vm11, %v1218_v10, %v1220_v37  ;;  %v1223_v58 = vsel %vm1221_vm11, %v1216_v52, %v1218_v10 }
 0x15c   : > { %v1228_v59 = vadd.f32 %v1223_v58, %v1199_v48  ;;  %v1229_v35 = vadd.f32 %v1222_v62, %v1200_v3  ;;  %1722 = vrot.lane.b32.xlu0 %v3978_v18, %s2362_s24 }
 0x15d   : > { %v1290_v1 = vpop.permute.xlu1 %1289 }
 0x15e   : > { %1232 = vst [vmem:[%s3741_s11 + $0x10] sm:$0xff] %v1228_v59  ;;  %1233 = vst [vmem:[%s3741_s11 + $0x18] sm:$0xff] %v1229_v35  ;;  %v1288_v22 = vpop.permute.xlu0 %1287 }
 0x15f   : > { %1728 = vrot.lane.b32.xlu1 %v3980_v60, %s2362_s24  ;;  %v1300_v39 = vsel %vm777_vm0, %v1288_v22, %v1290_v1 }
 0x160   : > { %v1301_v17 = vadd.f32 %v1300_v39, %v1258_v57  ;;  %1726 = vrot.lane.b32.xlu0 %v3981_v20, %s2362_s24 }
 0x161   : > { %v1294_v43 = vpop.permute.xlu1 %1293 }
 0x162   : > { %v1292_v23 = vpop.permute.xlu0 %1291 }
 0x163   : > { %v1298_v33 = vsel %vm777_vm0, %v1292_v23, %v1294_v43  ;;  %v1299_v63 = vsel %vm777_vm0, %v1290_v1, %v1292_v23 }
 0x164   : > { %v1302_v24 = vadd.f32 %v1299_v63, %v3982_v38  ;;  %v1303_v2 = vadd.f32 %v1298_v33, %v3983_v7 }
 0x165   : > { %v1331_v13 = vpop.permute.xlu1 %1330 }
 0x166   : > { %v1296_v25 = vpop.permute.xlu0 %1295 }
 0x167   : > { %v1297_v31 = vsel %vm777_vm0, %v1294_v43, %v1296_v25 }
 0x168   : > { %v1304_v6 = vadd.f32 %v1297_v31, %v3984_v53 }
 0x169   : > { %v1335_v29 = vpop.permute.xlu1 %1334 }
 0x16a   : > { %v1333_v54 = vpop.permute.xlu0 %1332 }
 0x16b   : > { %v1342_v19 = vsel %vm821_vm1, %v1333_v54, %v1335_v29  ;;  %v1343_v34 = vsel %vm821_vm1, %v1331_v13, %v1333_v54 }
 0x16c   : > { %v1344_v9 = vadd.f32 %v1343_v34, %v1301_v17  ;;  %v1345_v41 = vadd.f32 %v1342_v19, %v1302_v24 }
 0x16d   : > { %v1339_v40 = vpop.permute.xlu1 %1338 }
 0x16e   : > { %v1337_v44 = vpop.permute.xlu0 %1336 }
 0x16f   : > { %v1340_v32 = vsel %vm821_vm1, %v1337_v44, %v1339_v40  ;;  %v1341_v49 = vsel %vm821_vm1, %v1335_v29, %v1337_v44 }
 0x170   : > { %v1346_v26 = vadd.f32 %v1341_v49, %v1303_v2  ;;  %v1347_v56 = vadd.f32 %v1340_v32, %v1304_v6 }
 0x171   : > { %v1376_v52 = vpop.permute.xlu1 %1375 }
 0x172   : > { %v1374_v16 = vpop.permute.xlu0 %1373 }
 0x173   : > { %v1386_v42 = vsel %vm865_vm2, %v1374_v16, %v1376_v52 }
 0x174   : > { %v1387_v28 = vadd.f32 %v1386_v42, %v1344_v9 }
 0x175   : > { %v1380_v12 = vpop.permute.xlu1 %1379 }
 0x176   : > { %v1378_v30 = vpop.permute.xlu0 %1377 }
 0x177   : > { %v1384_v61 = vsel %vm865_vm2, %v1378_v30, %v1380_v12  ;;  %v1385_v0 = vsel %vm865_vm2, %v1376_v52, %v1378_v30 }
 0x178   : > { %v1388_v4 = vadd.f32 %v1385_v0, %v1345_v41  ;;  %v1389_v51 = vadd.f32 %v1384_v61, %v1346_v26 }
 0x179   : > { %v1417_v55 = vpop.permute.xlu1 %1416 }
 0x17a   : > { %v1382_v45 = vpop.permute.xlu0 %1381 }
 0x17b   : > { %v1383_v36 = vsel %vm865_vm2, %v1380_v12, %v1382_v45 }
 0x17c   : > { %v1390_v11 = vadd.f32 %v1383_v36, %v1347_v56 }
 0x17d   : > { %v1421_v21 = vpop.permute.xlu1 %1420 }
 0x17e   : > { %v1419_v46 = vpop.permute.xlu0 %1418 }
 0x17f   : > { %v1428_v15 = vsel %vm909_vm3, %v1419_v46, %v1421_v21  ;;  %v1429_v14 = vsel %vm909_vm3, %v1417_v55, %v1419_v46 }
 0x180   : > { %v1430_v8 = vadd.f32 %v1429_v14, %v1387_v28  ;;  %v1431_v27 = vadd.f32 %v1428_v15, %v1388_v4 }
 0x181   : > { %v1425_v37 = vpop.permute.xlu1 %1424 }
 0x182   : > { %v1423_v48 = vpop.permute.xlu0 %1422 }
 0x183   : > { %v1426_v3 = vsel %vm909_vm3, %v1423_v48, %v1425_v37  ;;  %v1427_v10 = vsel %vm909_vm3, %v1421_v21, %v1423_v48 }
 0x184   : > { %v1432_v5 = vadd.f32 %v1427_v10, %v1389_v51  ;;  %v1433_v62 = vadd.f32 %v1426_v3, %v1390_v11 }
 0x185   : > { %v1462_v58 = vpop.permute.xlu1 %1461 }
 0x186   : > { %v1460_v59 = vpop.permute.xlu0 %1459 }
 0x187   : > { %v1472_v41 = vsel %vm953_vm4, %v1460_v59, %v1462_v58 }
 0x188   : > { %v1473_v26 = vadd.f32 %v1472_v41, %v1430_v8 }
 0x189   : > { %v1466_v35 = vpop.permute.xlu1 %1465 }
 0x18a   : > { %v1464_v18 = vpop.permute.xlu0 %1463 }
 0x18b   : > { %v1471_v40 = vsel %vm953_vm4, %v1462_v58, %v1464_v18  ;;  %v1470_v16 = vsel %vm953_vm4, %v1464_v18, %v1466_v35 }
 0x18c   : > { %v1474_v56 = vadd.f32 %v1471_v40, %v1431_v27  ;;  %v1475_v36 = vadd.f32 %v1470_v16, %v1432_v5 }
 0x18d   : > { %v1503_v1 = vpop.permute.xlu1 %1502 }
 0x18e   : > { %v1468_v50 = vpop.permute.xlu0 %1467 }
 0x18f   : > { %v1469_v42 = vsel %vm953_vm4, %v1466_v35, %v1468_v50 }
 0x190   : > { %v1476_v11 = vadd.f32 %v1469_v42, %v1433_v62 }
 0x191   : > { %v1507_v57 = vpop.permute.xlu1 %1506 }
 0x192   : > { %v1505_v22 = vpop.permute.xlu0 %1504 }
 0x193   : > { %v1514_v32 = vsel %vm997_vm5, %v1505_v22, %v1507_v57  ;;  %v1515_v49 = vsel %vm997_vm5, %v1503_v1, %v1505_v22 }
 0x194   : > { %v1516_v30 = vadd.f32 %v1515_v49, %v1473_v26  ;;  %v1517_v61 = vadd.f32 %v1514_v32, %v1474_v56 }
 0x195   : > { %v1511_v60 = vpop.permute.xlu1 %1510 }
 0x196   : > { %v1509_v39 = vpop.permute.xlu0 %1508 }
 0x197   : > { %v1512_v4 = vsel %vm997_vm5, %v1509_v39, %v1511_v60  ;;  %v1513_v51 = vsel %vm997_vm5, %v1507_v57, %v1509_v39 }
 0x198   : > { %v1518_v48 = vadd.f32 %v1513_v51, %v1475_v36  ;;  %v1519_v3 = vadd.f32 %v1512_v4, %v1476_v11 }
 0x199   : > { %v1543_v17 = vpop.permute.xlu1 %1542 }
 0x19a   : > { %v1541_v20 = vpop.permute.xlu0 %1540 }
 0x19b   : > { %v1553_v28 = vsel %vm1036_vm6, %v1541_v20, %v1543_v17 }
 0x19c   : > { %v1554_v21 = vadd.f32 %v1553_v28, %v1516_v30 }
 0x19d   : > { %v1547_v43 = vpop.permute.xlu1 %1546 }
 0x19e   : > { %v1545_v23 = vpop.permute.xlu0 %1544 }
 0x19f   : > { %v1552_v12 = vsel %vm1036_vm6, %v1543_v17, %v1545_v23  ;;  %v1551_v14 = vsel %vm1036_vm6, %v1545_v23, %v1547_v43 }
 0x1a0   : > { %v1555_v46 = vadd.f32 %v1552_v12, %v1517_v61  ;;  %v1556_v1 = vadd.f32 %v1551_v14, %v1518_v48 }
 0x1a1   : > { %v1579_v33 = vpop.permute.xlu1 %1578 }
 0x1a2   : > { %v1549_v63 = vpop.permute.xlu0 %1548 }
 0x1a3   : > { %v1550_v8 = vsel %vm1036_vm6, %v1547_v43, %v1549_v63 }
 0x1a4   : > { %v1557_v50 = vadd.f32 %v1550_v8, %v1519_v3 }
 0x1a5   : > { %v1583_v38 = vpop.permute.xlu1 %1582 }
 0x1a6   : > { %v1581_v24 = vpop.permute.xlu0 %1580 }
 0x1a7   : > { %v1590_v55 = vsel %vm1075_vm7, %v1581_v24, %v1583_v38  ;;  %v1591_v45 = vsel %vm1075_vm7, %v1579_v33, %v1581_v24 }
 0x1a8   : > { %v1592_v10 = vadd.f32 %v1591_v45, %v1554_v21  ;;  %v1593_v5 = vadd.f32 %v1590_v55, %v1555_v46 }
 0x1a9   : > { %v1587_v7 = vpop.permute.xlu1 %1586 }
 0x1aa   : > { %v1585_v2 = vpop.permute.xlu0 %1584 }
 0x1ab   : > { %v1588_v58 = vsel %vm1075_vm7, %v1585_v2, %v1587_v7  ;;  %v1589_v59 = vsel %vm1075_vm7, %v1583_v38, %v1585_v2 }
 0x1ac   : > { %v1594_v23 = vadd.f32 %v1589_v59, %v1556_v1  ;;  %v1595_v33 = vadd.f32 %v1588_v58, %v1557_v50 }
 0x1ad   : > { %v1619_v13 = vpop.permute.xlu1 %1618 }
 0x1ae   : > { %v1617_v25 = vpop.permute.xlu0 %1616 }
 0x1af   : > { %v1629_v27 = vsel %vm1114_vm8, %v1617_v25, %v1619_v13 }
 0x1b0   : > { %v1630_v57 = vadd.f32 %v1629_v27, %v1592_v10 }
 0x1b1   : > { %v1623_v31 = vpop.permute.xlu1 %1622 }
 0x1b2   : > { %v1621_v53 = vpop.permute.xlu0 %1620 }
 0x1b3   : > { %v1628_v37 = vsel %vm1114_vm8, %v1619_v13, %v1621_v53  ;;  %v1627_v39 = vsel %vm1114_vm8, %v1621_v53, %v1623_v31 }
 0x1b4   : > { %v1631_v22 = vadd.f32 %v1628_v37, %v1593_v5  ;;  %v1632_v13 = vadd.f32 %v1627_v39, %v1594_v23 }
 0x1b5   : > { %v1655_v6 = vpop.permute.xlu1 %1654 }
 0x1b6   : > { %v1625_v29 = vpop.permute.xlu0 %1624 }
 0x1b7   : > { %v1626_v17 = vsel %vm1114_vm8, %v1623_v31, %v1625_v29 }
 0x1b8   : > { %v1633_v25 = vadd.f32 %v1626_v17, %v1595_v33 }
 0x1b9   : > { %v1659_v54 = vpop.permute.xlu1 %1658 }
 0x1ba   : > { %v1657_v19 = vpop.permute.xlu0 %1656 }
 0x1bb   : > { %v1666_v35 = vsel %vm1153_vm9, %v1657_v19, %v1659_v54  ;;  %v1667_v18 = vsel %vm1153_vm9, %v1655_v6, %v1657_v19 }
 0x1bc   : > { %v1668_v63 = vadd.f32 %v1667_v18, %v1630_v57  ;;  %v1669_v38 = vadd.f32 %v1666_v35, %v1631_v22 }
 0x1bd   : > { %v1663_v34 = vpop.permute.xlu1 %1662 }
 0x1be   : > { %v1661_v9 = vpop.permute.xlu0 %1660 }
 0x1bf   : > { %v1664_v7 = vsel %vm1153_vm9, %v1661_v9, %v1663_v34  ;;  %v1665_v2 = vsel %vm1153_vm9, %v1659_v54, %v1661_v9 }
 0x1c0   : > { %v1670_v34 = vadd.f32 %v1665_v2, %v1632_v13  ;;  %v1671_v9 = vadd.f32 %v1664_v7, %v1633_v25 }
 0x1c1   : > { %v1695_v44 = vpop.permute.xlu1 %1694 }
 0x1c2   : > { %v1693_v52 = vpop.permute.xlu0 %1692 }
 0x1c3   : > { %v1705_v20 = vsel %vm1192_vm10, %v1693_v52, %v1695_v44 }
 0x1c4   : > { %v1706_v31 = vadd.f32 %v1705_v20, %v1668_v63 }
 0x1c5   : > { %v1699_v0 = vpop.permute.xlu1 %1698 }
 0x1c6   : > { %v1697_v15 = vpop.permute.xlu0 %1696 }
 0x1c7   : > { %v1704_v43 = vsel %vm1192_vm10, %v1695_v44, %v1697_v15  ;;  %v1703_v29 = vsel %vm1192_vm10, %v1697_v15, %v1699_v0 }
 0x1c8   : > { %v1707_v53 = vadd.f32 %v1704_v43, %v1669_v38  ;;  %v1708_v49 = vadd.f32 %v1703_v29, %v1670_v34 }
 0x1c9   : > { %v1721_v62 = vpop.permute.xlu1 %1720 }
 0x1ca   : > { %v1701_v60 = vpop.permute.xlu0 %1700 }
 0x1cb   : > { %v1702_v19 = vsel %vm1192_vm10, %v1699_v0, %v1701_v60 }
 0x1cc   : > { %v1709_v26 = vadd.f32 %v1702_v19, %v1671_v9 }
 0x1cd   : > { %v1725_v24 = vpop.permute.xlu1 %1724 }
 0x1ce   : > { %v1723_v6 = vpop.permute.xlu0 %1722 }
 0x1cf   : > { %v1732_v41 = vsel %vm1221_vm11, %v1723_v6, %v1725_v24  ;;  %v1733_v54 = vsel %vm1221_vm11, %v1721_v62, %v1723_v6 }
 0x1d0   : > { %v1734_v40 = vadd.f32 %v1733_v54, %v1706_v31  ;;  %v1735_v44 = vadd.f32 %v1732_v41, %v1707_v53 }
 0x1d1   : > { %v1729_v32 = vpop.permute.xlu1 %1728 }
 0x1d2   : > { %1738 = vst [vmem:[%s3741_s11 + $0x20] sm:$0xff] %v1734_v40  ;;  %1739 = vst [vmem:[%s3741_s11 + $0x28] sm:$0xff] %v1735_v44  ;;  %v1727_v56 = vpop.permute.xlu0 %1726 }
 0x1d3   : > { %v1730_v52 = vsel %vm1221_vm11, %v1727_v56, %v1729_v32  ;;  %v1731_v16 = vsel %vm1221_vm11, %v1725_v24, %v1727_v56 }
 0x1d4   : > { %v1736_v42 = vadd.f32 %v1731_v16, %v1708_v49  ;;  %v1737_v28 = vadd.f32 %v1730_v52, %v1709_v26 }
 0x1d6   : > { %1740 = vst [vmem:[%s3741_s11 + $0x30] sm:$0xff] %v1736_v42  ;;  %1741 = vst [vmem:[%s3741_s11 + $0x38] sm:$0xff] %v1737_v28 }
 0x1d7 PF: > { %s12_s15 = sadd.s32 1, %s2316_s15   ;;  %s3985_s9 = smov %s2296_s10 }
 0x1d8   : > { %p9_p5 = scmp.ge.s32.totalorder %s12_s15, 4   ;;  %s3986_s10 = smov %s2437_s27 }
 0x1d9   : > { %s3987_s11 = smov %s2304_s12  ;;  %s3988_s12 = smov %s2432_s26 }
 0x1da   : > { %s3989_s13 = smov %s2312_s14  ;;  %s3990_s14 = smov %s3992_s16 }
 0x1db   :  { %11 = sbr.rel (!%p9_p5) target bundleno = 4 (0x4), region = 237 }

</bundles_post_ra>
